<compile_context>
chip_gen: v7x
topology: tpu7x:2x2x1
jax: 0.10.0
libtpu: 0.0.40
codegen_flags: <defaults>
</compile_context>

<pallas_src>
import jax
import jax.numpy as jnp
from jax.experimental import pallas as pl
from jax.experimental.pallas import tpu as pltpu


def _lstm2_kernel(x_ref, w0_ref, b0_ref, w1_ref, b1_ref, out_ref):
    """Whole 2-layer LSTM forward in one invocation.

    x_ref : (T, B, W)  time-major, batch padded to a full sublane tile.
    w*_ref: (2W, 4W)   fused [W_ih; W_hh], gate order (i, f, o, g),
                        i/f/o columns pre-scaled by 0.5.
    b*_ref: (1, 4W)    fused bias, same reorder / prescale.
    out   : (B, W)     final hidden state of the last layer (h[-1]).
    """
    T, B, W = x_ref.shape

    w0 = w0_ref[...]
    w1 = w1_ref[...]
    # Hoisted broadcasts: emitted once, reused by all 2*T cell updates.
    b0 = jnp.broadcast_to(b0_ref[...], (B, 4 * W))
    b1 = jnp.broadcast_to(b1_ref[...], (B, 4 * W))

    def cell(gates, c_prev):
        # Single EUP region over the full (B, 4W) gate vreg.
        t = jnp.tanh(gates)
        # sigmoid(z) = 0.5 * tanh(z/2) + 0.5  (weights/bias pre-scaled by 0.5).
        sig = t[:, :3 * W] * 0.5 + 0.5
        i = sig[:, :W]
        f = sig[:, W:2 * W]
        o = sig[:, 2 * W:]
        g = t[:, 3 * W:]
        c_new = f * c_prev + i * g
        h_new = o * jnp.tanh(c_new)
        return h_new, c_new

    zeros = jnp.zeros((B, W), jnp.float32)
    h0, c0 = zeros, zeros
    h1, c1 = zeros, zeros
    h0_prev = zeros  # layer-0 output of the previous iteration (time k-1)

    # Interleaved schedule, statically unrolled:
    #   iter k computes layer-1 step k-1 (from h0_prev) and layer-0 step k.
    # Within an iteration the two cells are independent, so MXU/EUP/VPU work
    # overlaps; the critical chain is ~T+1 cell latencies instead of 2T.
    for k in range(T + 1):
        if k >= 1:
            g1 = jnp.dot(jnp.concatenate([h0_prev, h1], axis=1), w1,
                         preferred_element_type=jnp.float32) + b1
            h1, c1 = cell(g1, c1)
        if k < T:
            g0 = jnp.dot(jnp.concatenate([x_ref[k], h0], axis=1), w0,
                         preferred_element_type=jnp.float32) + b0
            h0, c0 = cell(g0, c0)
            h0_prev = h0

    # predicted_val = h[-1]  (final hidden state of the last layer)
    out_ref[...] = h1.astype(out_ref.dtype)


def modelG_forward(x, kernel_params):
    """x: (B, T, W) batch-first, like the PyTorch module.  Returns (B, W)."""
    B, T, W = x.shape
    w0, b0, w1, b1 = kernel_params

    # Pad the batch to a full f32 sublane tile (8) and go time-major so every
    # per-step slice inside the kernel is a whole aligned (B_pad, W) tile.
    B_pad = max(8, -(-B // 8) * 8)
    x_p = jnp.zeros((B_pad, T, W), x.dtype).at[:B, :, :].set(x)
    x_tm = jnp.transpose(x_p, (1, 0, 2))  # (T, B_pad, W)

    vmem = lambda: pl.BlockSpec(memory_space=pltpu.MemorySpace.VMEM)
    out = pl.pallas_call(
        _lstm2_kernel,
        out_shape=jax.ShapeDtypeStruct((B_pad, W), x.dtype),
        in_specs=[vmem() for _ in range(5)],
        out_specs=vmem(),
    )(x_tm, w0, b0, w1, b1)
    return out[:B]


def init_lstm_params(key, window):
    """Deterministic init with PyTorch LSTM shapes: per layer
    weight_ih (4H, in), weight_hh (4H, H), bias_ih (4H,), bias_hh (4H,).
    Returns (raw_params_for_reference, kernel_params)."""
    H = window
    bound = 1.0 / jnp.sqrt(jnp.float32(H))
    keys = jax.random.split(key, 8)
    u = lambda k, shape: jax.random.uniform(k, shape, jnp.float32, -bound, bound)
    wih0, whh0 = u(keys[0], (4 * H, H)), u(keys[1], (4 * H, H))
    bih0, bhh0 = u(keys[2], (4 * H,)), u(keys[3], (4 * H,))
    wih1, whh1 = u(keys[4], (4 * H, H)), u(keys[5], (4 * H, H))
    bih1, bhh1 = u(keys[6], (4 * H,)), u(keys[7], (4 * H,))
    raw = (wih0, whh0, bih0, bhh0, wih1, whh1, bih1, bhh1)

    def kernel_form(wih, whh, bih, bhh):
        def reorder(a):  # PyTorch gate order (i, f, g, o) -> kernel (i, f, o, g)
            i, f, g, o = jnp.split(a, 4, axis=0)
            return jnp.concatenate([i, f, o, g], axis=0)
        # Fused [W_ih; W_hh] for the per-step [x_t (+) h] matmul.
        w = jnp.concatenate([reorder(wih).T, reorder(whh).T], axis=0)  # (2H, 4H)
        b = reorder(bih + bhh)[None, :]                                # (1, 4H)
        # Pre-scale sigmoid-gate (i, f, o = first 3H) columns by 0.5 so the
        # kernel can use sigmoid(z) = 0.5 * tanh(z/2) + 0.5 with ONE tanh.
        scale = jnp.concatenate([jnp.full((3 * H,), 0.5, jnp.float32),
                                 jnp.ones((H,), jnp.float32)])[None, :]
        return w * scale, b * scale

    w0, b0 = kernel_form(wih0, whh0, bih0, bhh0)
    w1, b1 = kernel_form(wih1, whh1, bih1, bhh1)
    return raw, (w0, b0, w1, b1)


def modelG_reference(x, raw_params):
    """Pure-JAX reference of torch.nn.LSTM(num_layers=2, batch_first=True) -> h[-1]."""
    wih0, whh0, bih0, bhh0, wih1, whh1, bih1, bhh1 = raw_params
    B, T, W = x.shape

    def cell(x_in, h, c, wih, whh, bih, bhh):
        gates = x_in @ wih.T + bih + h @ whh.T + bhh
        i, f, g, o = jnp.split(gates, 4, axis=-1)
        c = jax.nn.sigmoid(f) * c + jax.nn.sigmoid(i) * jnp.tanh(g)
        h = jax.nn.sigmoid(o) * jnp.tanh(c)
        return h, c

    def step(carry, x_t):
        h0, c0, h1, c1 = carry
        h0, c0 = cell(x_t, h0, c0, wih0, whh0, bih0, bhh0)
        h1, c1 = cell(h0, h1, c1, wih1, whh1, bih1, bhh1)
        return (h0, c0, h1, c1), None

    z = jnp.zeros((B, W), jnp.float32)
    (h0, c0, h1, c1), _ = jax.lax.scan(step, (z, z, z, z),
                                       jnp.transpose(x, (1, 0, 2)))
    return h1


if __name__ == "__main__":
    B, T, window = 2, 8, 32  # batch, seq len, window (= input_size = hidden_size)
    key = jax.random.PRNGKey(0)
    kx, kp = jax.random.split(key)
    x = jax.random.normal(kx, (B, T, window), jnp.float32)
    raw_params, kernel_params = init_lstm_params(kp, window)

    out = jax.block_until_ready(modelG_forward(x, kernel_params))

    ref = modelG_reference(x, raw_params)
    assert out.shape == (B, window)
    assert jnp.allclose(out, ref, atol=3e-5, rtol=3e-5), "mismatch vs reference"
    print("KERNEL_OK")
</pallas_src>

<mosaic_0001>
module attributes {stable_mosaic.version = 11 : i64} {
  func.func @_lstm2_kernel(%arg0: memref<8x8x32xf32, #tpu.memory_space<vmem>>, %arg1: memref<64x128xf32, #tpu.memory_space<vmem>>, %arg2: memref<1x128xf32, #tpu.memory_space<vmem>>, %arg3: memref<64x128xf32, #tpu.memory_space<vmem>>, %arg4: memref<1x128xf32, #tpu.memory_space<vmem>>, %arg5: memref<8x32xf32, #tpu.memory_space<vmem>>) attributes {dimension_semantics = [], scalar_prefetch = 0 : i64, scratch_operands = 0 : i64, tpu.core_type = #tpu.core_type<tc>} {
    %c0 = arith.constant 0 : index
    %c0_0 = arith.constant 0 : index
    %0 = vector.load %arg1[%c0, %c0_0] : memref<64x128xf32, #tpu.memory_space<vmem>>, vector<64x128xf32>
    %c0_1 = arith.constant 0 : index
    %c0_2 = arith.constant 0 : index
    %1 = vector.load %arg3[%c0_1, %c0_2] : memref<64x128xf32, #tpu.memory_space<vmem>>, vector<64x128xf32>
    %c0_3 = arith.constant 0 : index
    %c0_4 = arith.constant 0 : index
    %2 = vector.load %arg2[%c0_3, %c0_4] : memref<1x128xf32, #tpu.memory_space<vmem>>, vector<1x128xf32>
    %3 = vector.shape_cast %2 : vector<1x128xf32> to vector<1x128xf32>
    %4 = vector.broadcast %3 : vector<1x128xf32> to vector<8x128xf32>
    %c0_5 = arith.constant 0 : index
    %c0_6 = arith.constant 0 : index
    %5 = vector.load %arg4[%c0_5, %c0_6] : memref<1x128xf32, #tpu.memory_space<vmem>>, vector<1x128xf32>
    %6 = vector.shape_cast %5 : vector<1x128xf32> to vector<1x128xf32>
    %7 = vector.broadcast %6 : vector<1x128xf32> to vector<8x128xf32>
    %cst = arith.constant 0.000000e+00 : f32
    %8 = vector.broadcast %cst : f32 to vector<8x32xf32>
    %c0_7 = arith.constant 0 : index
    %c0_8 = arith.constant 0 : index
    %c0_9 = arith.constant 0 : index
    %9 = vector.load %arg0[%c0_7, %c0_8, %c0_9] : memref<8x8x32xf32, #tpu.memory_space<vmem>>, vector<1x8x32xf32>
    %10 = vector.shape_cast %9 : vector<1x8x32xf32> to vector<8x32xf32>
    %11 = tpu.concatenate %10, %8 in 1 : vector<8x32xf32>, vector<8x32xf32> -> vector<8x64xf32>
    %cst_10 = arith.constant dense<0.000000e+00> : vector<8x128xf32>
    %12 = tpu.matmul %11, %0, %cst_10 {dimension_numbers = #tpu.dot_dimension_numbers<[1], [0], [0], [1], [0, 0, 1, 1], [], []>} : vector<8x64xf32>, vector<64x128xf32>, vector<8x128xf32> -> vector<8x128xf32>
    %13 = arith.addf %12, %4 : vector<8x128xf32>
    %14 = math.tanh %13 : vector<8x128xf32>
    %15 = vector.extract_strided_slice %14 {offsets = [0, 0], sizes = [8, 96], strides = [1, 1]} : vector<8x128xf32> to vector<8x96xf32>
    %cst_11 = arith.constant 5.000000e-01 : f32
    %16 = vector.broadcast %cst_11 : f32 to vector<8x96xf32>
    %17 = arith.mulf %15, %16 : vector<8x96xf32>
    %cst_12 = arith.constant 5.000000e-01 : f32
    %18 = vector.broadcast %cst_12 : f32 to vector<8x96xf32>
    %19 = arith.addf %17, %18 : vector<8x96xf32>
    %20 = vector.extract_strided_slice %19 {offsets = [0, 0], sizes = [8, 32], strides = [1, 1]} : vector<8x96xf32> to vector<8x32xf32>
    %21 = vector.extract_strided_slice %19 {offsets = [0, 32], sizes = [8, 32], strides = [1, 1]} : vector<8x96xf32> to vector<8x32xf32>
    %22 = vector.extract_strided_slice %19 {offsets = [0, 64], sizes = [8, 32], strides = [1, 1]} : vector<8x96xf32> to vector<8x32xf32>
    %23 = vector.extract_strided_slice %14 {offsets = [0, 96], sizes = [8, 32], strides = [1, 1]} : vector<8x128xf32> to vector<8x32xf32>
    %24 = arith.mulf %21, %8 : vector<8x32xf32>
    %25 = arith.mulf %20, %23 : vector<8x32xf32>
    %26 = arith.addf %24, %25 : vector<8x32xf32>
    %27 = math.tanh %26 : vector<8x32xf32>
    %28 = arith.mulf %22, %27 : vector<8x32xf32>
    %29 = tpu.concatenate %28, %8 in 1 : vector<8x32xf32>, vector<8x32xf32> -> vector<8x64xf32>
    %cst_13 = arith.constant dense<0.000000e+00> : vector<8x128xf32>
    %30 = tpu.matmul %29, %1, %cst_13 {dimension_numbers = #tpu.dot_dimension_numbers<[1], [0], [0], [1], [0, 0, 1, 1], [], []>} : vector<8x64xf32>, vector<64x128xf32>, vector<8x128xf32> -> vector<8x128xf32>
    %31 = arith.addf %30, %7 : vector<8x128xf32>
    %32 = math.tanh %31 : vector<8x128xf32>
    %33 = vector.extract_strided_slice %32 {offsets = [0, 0], sizes = [8, 96], strides = [1, 1]} : vector<8x128xf32> to vector<8x96xf32>
    %cst_14 = arith.constant 5.000000e-01 : f32
    %34 = vector.broadcast %cst_14 : f32 to vector<8x96xf32>
    %35 = arith.mulf %33, %34 : vector<8x96xf32>
    %cst_15 = arith.constant 5.000000e-01 : f32
    %36 = vector.broadcast %cst_15 : f32 to vector<8x96xf32>
    %37 = arith.addf %35, %36 : vector<8x96xf32>
    %38 = vector.extract_strided_slice %37 {offsets = [0, 0], sizes = [8, 32], strides = [1, 1]} : vector<8x96xf32> to vector<8x32xf32>
    %39 = vector.extract_strided_slice %37 {offsets = [0, 32], sizes = [8, 32], strides = [1, 1]} : vector<8x96xf32> to vector<8x32xf32>
    %40 = vector.extract_strided_slice %37 {offsets = [0, 64], sizes = [8, 32], strides = [1, 1]} : vector<8x96xf32> to vector<8x32xf32>
    %41 = vector.extract_strided_slice %32 {offsets = [0, 96], sizes = [8, 32], strides = [1, 1]} : vector<8x128xf32> to vector<8x32xf32>
    %42 = arith.mulf %39, %8 : vector<8x32xf32>
    %43 = arith.mulf %38, %41 : vector<8x32xf32>
    %44 = arith.addf %42, %43 : vector<8x32xf32>
    %45 = math.tanh %44 : vector<8x32xf32>
    %46 = arith.mulf %40, %45 : vector<8x32xf32>
    %c1 = arith.constant 1 : index
    %c0_16 = arith.constant 0 : index
    %c0_17 = arith.constant 0 : index
    %47 = vector.load %arg0[%c1, %c0_16, %c0_17] : memref<8x8x32xf32, #tpu.memory_space<vmem>>, vector<1x8x32xf32>
    %48 = vector.shape_cast %47 : vector<1x8x32xf32> to vector<8x32xf32>
    %49 = tpu.concatenate %48, %28 in 1 : vector<8x32xf32>, vector<8x32xf32> -> vector<8x64xf32>
    %cst_18 = arith.constant dense<0.000000e+00> : vector<8x128xf32>
    %50 = tpu.matmul %49, %0, %cst_18 {dimension_numbers = #tpu.dot_dimension_numbers<[1], [0], [0], [1], [0, 0, 1, 1], [], []>} : vector<8x64xf32>, vector<64x128xf32>, vector<8x128xf32> -> vector<8x128xf32>
    %51 = arith.addf %50, %4 : vector<8x128xf32>
    %52 = math.tanh %51 : vector<8x128xf32>
    %53 = vector.extract_strided_slice %52 {offsets = [0, 0], sizes = [8, 96], strides = [1, 1]} : vector<8x128xf32> to vector<8x96xf32>
    %cst_19 = arith.constant 5.000000e-01 : f32
    %54 = vector.broadcast %cst_19 : f32 to vector<8x96xf32>
    %55 = arith.mulf %53, %54 : vector<8x96xf32>
    %cst_20 = arith.constant 5.000000e-01 : f32
    %56 = vector.broadcast %cst_20 : f32 to vector<8x96xf32>
    %57 = arith.addf %55, %56 : vector<8x96xf32>
    %58 = vector.extract_strided_slice %57 {offsets = [0, 0], sizes = [8, 32], strides = [1, 1]} : vector<8x96xf32> to vector<8x32xf32>
    %59 = vector.extract_strided_slice %57 {offsets = [0, 32], sizes = [8, 32], strides = [1, 1]} : vector<8x96xf32> to vector<8x32xf32>
    %60 = vector.extract_strided_slice %57 {offsets = [0, 64], sizes = [8, 32], strides = [1, 1]} : vector<8x96xf32> to vector<8x32xf32>
    %61 = vector.extract_strided_slice %52 {offsets = [0, 96], sizes = [8, 32], strides = [1, 1]} : vector<8x128xf32> to vector<8x32xf32>
    %62 = arith.mulf %59, %26 : vector<8x32xf32>
    %63 = arith.mulf %58, %61 : vector<8x32xf32>
    %64 = arith.addf %62, %63 : vector<8x32xf32>
    %65 = math.tanh %64 : vector<8x32xf32>
    %66 = arith.mulf %60, %65 : vector<8x32xf32>
    %67 = tpu.concatenate %66, %46 in 1 : vector<8x32xf32>, vector<8x32xf32> -> vector<8x64xf32>
    %cst_21 = arith.constant dense<0.000000e+00> : vector<8x128xf32>
    %68 = tpu.matmul %67, %1, %cst_21 {dimension_numbers = #tpu.dot_dimension_numbers<[1], [0], [0], [1], [0, 0, 1, 1], [], []>} : vector<8x64xf32>, vector<64x128xf32>, vector<8x128xf32> -> vector<8x128xf32>
    %69 = arith.addf %68, %7 : vector<8x128xf32>
    %70 = math.tanh %69 : vector<8x128xf32>
    %71 = vector.extract_strided_slice %70 {offsets = [0, 0], sizes = [8, 96], strides = [1, 1]} : vector<8x128xf32> to vector<8x96xf32>
    %cst_22 = arith.constant 5.000000e-01 : f32
    %72 = vector.broadcast %cst_22 : f32 to vector<8x96xf32>
    %73 = arith.mulf %71, %72 : vector<8x96xf32>
    %cst_23 = arith.constant 5.000000e-01 : f32
    %74 = vector.broadcast %cst_23 : f32 to vector<8x96xf32>
    %75 = arith.addf %73, %74 : vector<8x96xf32>
    %76 = vector.extract_strided_slice %75 {offsets = [0, 0], sizes = [8, 32], strides = [1, 1]} : vector<8x96xf32> to vector<8x32xf32>
    %77 = vector.extract_strided_slice %75 {offsets = [0, 32], sizes = [8, 32], strides = [1, 1]} : vector<8x96xf32> to vector<8x32xf32>
    %78 = vector.extract_strided_slice %75 {offsets = [0, 64], sizes = [8, 32], strides = [1, 1]} : vector<8x96xf32> to vector<8x32xf32>
    %79 = vector.extract_strided_slice %70 {offsets = [0, 96], sizes = [8, 32], strides = [1, 1]} : vector<8x128xf32> to vector<8x32xf32>
    %80 = arith.mulf %77, %44 : vector<8x32xf32>
    %81 = arith.mulf %76, %79 : vector<8x32xf32>
    %82 = arith.addf %80, %81 : vector<8x32xf32>
    %83 = math.tanh %82 : vector<8x32xf32>
    %84 = arith.mulf %78, %83 : vector<8x32xf32>
    %c2 = arith.constant 2 : index
    %c0_24 = arith.constant 0 : index
    %c0_25 = arith.constant 0 : index
    %85 = vector.load %arg0[%c2, %c0_24, %c0_25] : memref<8x8x32xf32, #tpu.memory_space<vmem>>, vector<1x8x32xf32>
    %86 = vector.shape_cast %85 : vector<1x8x32xf32> to vector<8x32xf32>
    %87 = tpu.concatenate %86, %66 in 1 : vector<8x32xf32>, vector<8x32xf32> -> vector<8x64xf32>
    %cst_26 = arith.constant dense<0.000000e+00> : vector<8x128xf32>
    %88 = tpu.matmul %87, %0, %cst_26 {dimension_numbers = #tpu.dot_dimension_numbers<[1], [0], [0], [1], [0, 0, 1, 1], [], []>} : vector<8x64xf32>, vector<64x128xf32>, vector<8x128xf32> -> vector<8x128xf32>
    %89 = arith.addf %88, %4 : vector<8x128xf32>
    %90 = math.tanh %89 : vector<8x128xf32>
    %91 = vector.extract_strided_slice %90 {offsets = [0, 0], sizes = [8, 96], strides = [1, 1]} : vector<8x128xf32> to vector<8x96xf32>
    %cst_27 = arith.constant 5.000000e-01 : f32
    %92 = vector.broadcast %cst_27 : f32 to vector<8x96xf32>
    %93 = arith.mulf %91, %92 : vector<8x96xf32>
    %cst_28 = arith.constant 5.000000e-01 : f32
    %94 = vector.broadcast %cst_28 : f32 to vector<8x96xf32>
    %95 = arith.addf %93, %94 : vector<8x96xf32>
    %96 = vector.extract_strided_slice %95 {offsets = [0, 0], sizes = [8, 32], strides = [1, 1]} : vector<8x96xf32> to vector<8x32xf32>
    %97 = vector.extract_strided_slice %95 {offsets = [0, 32], sizes = [8, 32], strides = [1, 1]} : vector<8x96xf32> to vector<8x32xf32>
    %98 = vector.extract_strided_slice %95 {offsets = [0, 64], sizes = [8, 32], strides = [1, 1]} : vector<8x96xf32> to vector<8x32xf32>
    %99 = vector.extract_strided_slice %90 {offsets = [0, 96], sizes = [8, 32], strides = [1, 1]} : vector<8x128xf32> to vector<8x32xf32>
    %100 = arith.mulf %97, %64 : vector<8x32xf32>
    %101 = arith.mulf %96, %99 : vector<8x32xf32>
    %102 = arith.addf %100, %101 : vector<8x32xf32>
    %103 = math.tanh %102 : vector<8x32xf32>
    %104 = arith.mulf %98, %103 : vector<8x32xf32>
    %105 = tpu.concatenate %104, %84 in 1 : vector<8x32xf32>, vector<8x32xf32> -> vector<8x64xf32>
    %cst_29 = arith.constant dense<0.000000e+00> : vector<8x128xf32>
    %106 = tpu.matmul %105, %1, %cst_29 {dimension_numbers = #tpu.dot_dimension_numbers<[1], [0], [0], [1], [0, 0, 1, 1], [], []>} : vector<8x64xf32>, vector<64x128xf32>, vector<8x128xf32> -> vector<8x128xf32>
    %107 = arith.addf %106, %7 : vector<8x128xf32>
    %108 = math.tanh %107 : vector<8x128xf32>
    %109 = vector.extract_strided_slice %108 {offsets = [0, 0], sizes = [8, 96], strides = [1, 1]} : vector<8x128xf32> to vector<8x96xf32>
    %cst_30 = arith.constant 5.000000e-01 : f32
    %110 = vector.broadcast %cst_30 : f32 to vector<8x96xf32>
    %111 = arith.mulf %109, %110 : vector<8x96xf32>
    %cst_31 = arith.constant 5.000000e-01 : f32
    %112 = vector.broadcast %cst_31 : f32 to vector<8x96xf32>
    %113 = arith.addf %111, %112 : vector<8x96xf32>
    %114 = vector.extract_strided_slice %113 {offsets = [0, 0], sizes = [8, 32], strides = [1, 1]} : vector<8x96xf32> to vector<8x32xf32>
    %115 = vector.extract_strided_slice %113 {offsets = [0, 32], sizes = [8, 32], strides = [1, 1]} : vector<8x96xf32> to vector<8x32xf32>
    %116 = vector.extract_strided_slice %113 {offsets = [0, 64], sizes = [8, 32], strides = [1, 1]} : vector<8x96xf32> to vector<8x32xf32>
    %117 = vector.extract_strided_slice %108 {offsets = [0, 96], sizes = [8, 32], strides = [1, 1]} : vector<8x128xf32> to vector<8x32xf32>
    %118 = arith.mulf %115, %82 : vector<8x32xf32>
    %119 = arith.mulf %114, %117 : vector<8x32xf32>
    %120 = arith.addf %118, %119 : vector<8x32xf32>
    %121 = math.tanh %120 : vector<8x32xf32>
    %122 = arith.mulf %116, %121 : vector<8x32xf32>
    %c3 = arith.constant 3 : index
    %c0_32 = arith.constant 0 : index
    %c0_33 = arith.constant 0 : index
    %123 = vector.load %arg0[%c3, %c0_32, %c0_33] : memref<8x8x32xf32, #tpu.memory_space<vmem>>, vector<1x8x32xf32>
    %124 = vector.shape_cast %123 : vector<1x8x32xf32> to vector<8x32xf32>
    %125 = tpu.concatenate %124, %104 in 1 : vector<8x32xf32>, vector<8x32xf32> -> vector<8x64xf32>
    %cst_34 = arith.constant dense<0.000000e+00> : vector<8x128xf32>
    %126 = tpu.matmul %125, %0, %cst_34 {dimension_numbers = #tpu.dot_dimension_numbers<[1], [0], [0], [1], [0, 0, 1, 1], [], []>} : vector<8x64xf32>, vector<64x128xf32>, vector<8x128xf32> -> vector<8x128xf32>
    %127 = arith.addf %126, %4 : vector<8x128xf32>
    %128 = math.tanh %127 : vector<8x128xf32>
    %129 = vector.extract_strided_slice %128 {offsets = [0, 0], sizes = [8, 96], strides = [1, 1]} : vector<8x128xf32> to vector<8x96xf32>
    %cst_35 = arith.constant 5.000000e-01 : f32
    %130 = vector.broadcast %cst_35 : f32 to vector<8x96xf32>
    %131 = arith.mulf %129, %130 : vector<8x96xf32>
    %cst_36 = arith.constant 5.000000e-01 : f32
    %132 = vector.broadcast %cst_36 : f32 to vector<8x96xf32>
    %133 = arith.addf %131, %132 : vector<8x96xf32>
    %134 = vector.extract_strided_slice %133 {offsets = [0, 0], sizes = [8, 32], strides = [1, 1]} : vector<8x96xf32> to vector<8x32xf32>
    %135 = vector.extract_strided_slice %133 {offsets = [0, 32], sizes = [8, 32], strides = [1, 1]} : vector<8x96xf32> to vector<8x32xf32>
    %136 = vector.extract_strided_slice %133 {offsets = [0, 64], sizes = [8, 32], strides = [1, 1]} : vector<8x96xf32> to vector<8x32xf32>
    %137 = vector.extract_strided_slice %128 {offsets = [0, 96], sizes = [8, 32], strides = [1, 1]} : vector<8x128xf32> to vector<8x32xf32>
    %138 = arith.mulf %135, %102 : vector<8x32xf32>
    %139 = arith.mulf %134, %137 : vector<8x32xf32>
    %140 = arith.addf %138, %139 : vector<8x32xf32>
    %141 = math.tanh %140 : vector<8x32xf32>
    %142 = arith.mulf %136, %141 : vector<8x32xf32>
    %143 = tpu.concatenate %142, %122 in 1 : vector<8x32xf32>, vector<8x32xf32> -> vector<8x64xf32>
    %cst_37 = arith.constant dense<0.000000e+00> : vector<8x128xf32>
    %144 = tpu.matmul %143, %1, %cst_37 {dimension_numbers = #tpu.dot_dimension_numbers<[1], [0], [0], [1], [0, 0, 1, 1], [], []>} : vector<8x64xf32>, vector<64x128xf32>, vector<8x128xf32> -> vector<8x128xf32>
    %145 = arith.addf %144, %7 : vector<8x128xf32>
    %146 = math.tanh %145 : vector<8x128xf32>
    %147 = vector.extract_strided_slice %146 {offsets = [0, 0], sizes = [8, 96], strides = [1, 1]} : vector<8x128xf32> to vector<8x96xf32>
    %cst_38 = arith.constant 5.000000e-01 : f32
    %148 = vector.broadcast %cst_38 : f32 to vector<8x96xf32>
    %149 = arith.mulf %147, %148 : vector<8x96xf32>
    %cst_39 = arith.constant 5.000000e-01 : f32
    %150 = vector.broadcast %cst_39 : f32 to vector<8x96xf32>
    %151 = arith.addf %149, %150 : vector<8x96xf32>
    %152 = vector.extract_strided_slice %151 {offsets = [0, 0], sizes = [8, 32], strides = [1, 1]} : vector<8x96xf32> to vector<8x32xf32>
    %153 = vector.extract_strided_slice %151 {offsets = [0, 32], sizes = [8, 32], strides = [1, 1]} : vector<8x96xf32> to vector<8x32xf32>
    %154 = vector.extract_strided_slice %151 {offsets = [0, 64], sizes = [8, 32], strides = [1, 1]} : vector<8x96xf32> to vector<8x32xf32>
    %155 = vector.extract_strided_slice %146 {offsets = [0, 96], sizes = [8, 32], strides = [1, 1]} : vector<8x128xf32> to vector<8x32xf32>
    %156 = arith.mulf %153, %120 : vector<8x32xf32>
    %157 = arith.mulf %152, %155 : vector<8x32xf32>
    %158 = arith.addf %156, %157 : vector<8x32xf32>
    %159 = math.tanh %158 : vector<8x32xf32>
    %160 = arith.mulf %154, %159 : vector<8x32xf32>
    %c4 = arith.constant 4 : index
    %c0_40 = arith.constant 0 : index
    %c0_41 = arith.constant 0 : index
    %161 = vector.load %arg0[%c4, %c0_40, %c0_41] : memref<8x8x32xf32, #tpu.memory_space<vmem>>, vector<1x8x32xf32>
    %162 = vector.shape_cast %161 : vector<1x8x32xf32> to vector<8x32xf32>
    %163 = tpu.concatenate %162, %142 in 1 : vector<8x32xf32>, vector<8x32xf32> -> vector<8x64xf32>
    %cst_42 = arith.constant dense<0.000000e+00> : vector<8x128xf32>
    %164 = tpu.matmul %163, %0, %cst_42 {dimension_numbers = #tpu.dot_dimension_numbers<[1], [0], [0], [1], [0, 0, 1, 1], [], []>} : vector<8x64xf32>, vector<64x128xf32>, vector<8x128xf32> -> vector<8x128xf32>
    %165 = arith.addf %164, %4 : vector<8x128xf32>
    %166 = math.tanh %165 : vector<8x128xf32>
    %167 = vector.extract_strided_slice %166 {offsets = [0, 0], sizes = [8, 96], strides = [1, 1]} : vector<8x128xf32> to vector<8x96xf32>
    %cst_43 = arith.constant 5.000000e-01 : f32
    %168 = vector.broadcast %cst_43 : f32 to vector<8x96xf32>
    %169 = arith.mulf %167, %168 : vector<8x96xf32>
    %cst_44 = arith.constant 5.000000e-01 : f32
    %170 = vector.broadcast %cst_44 : f32 to vector<8x96xf32>
    %171 = arith.addf %169, %170 : vector<8x96xf32>
    %172 = vector.extract_strided_slice %171 {offsets = [0, 0], sizes = [8, 32], strides = [1, 1]} : vector<8x96xf32> to vector<8x32xf32>
    %173 = vector.extract_strided_slice %171 {offsets = [0, 32], sizes = [8, 32], strides = [1, 1]} : vector<8x96xf32> to vector<8x32xf32>
    %174 = vector.extract_strided_slice %171 {offsets = [0, 64], sizes = [8, 32], strides = [1, 1]} : vector<8x96xf32> to vector<8x32xf32>
    %175 = vector.extract_strided_slice %166 {offsets = [0, 96], sizes = [8, 32], strides = [1, 1]} : vector<8x128xf32> to vector<8x32xf32>
    %176 = arith.mulf %173, %140 : vector<8x32xf32>
    %177 = arith.mulf %172, %175 : vector<8x32xf32>
    %178 = arith.addf %176, %177 : vector<8x32xf32>
    %179 = math.tanh %178 : vector<8x32xf32>
    %180 = arith.mulf %174, %179 : vector<8x32xf32>
    %181 = tpu.concatenate %180, %160 in 1 : vector<8x32xf32>, vector<8x32xf32> -> vector<8x64xf32>
    %cst_45 = arith.constant dense<0.000000e+00> : vector<8x128xf32>
    %182 = tpu.matmul %181, %1, %cst_45 {dimension_numbers = #tpu.dot_dimension_numbers<[1], [0], [0], [1], [0, 0, 1, 1], [], []>} : vector<8x64xf32>, vector<64x128xf32>, vector<8x128xf32> -> vector<8x128xf32>
    %183 = arith.addf %182, %7 : vector<8x128xf32>
    %184 = math.tanh %183 : vector<8x128xf32>
    %185 = vector.extract_strided_slice %184 {offsets = [0, 0], sizes = [8, 96], strides = [1, 1]} : vector<8x128xf32> to vector<8x96xf32>
    %cst_46 = arith.constant 5.000000e-01 : f32
    %186 = vector.broadcast %cst_46 : f32 to vector<8x96xf32>
    %187 = arith.mulf %185, %186 : vector<8x96xf32>
    %cst_47 = arith.constant 5.000000e-01 : f32
    %188 = vector.broadcast %cst_47 : f32 to vector<8x96xf32>
    %189 = arith.addf %187, %188 : vector<8x96xf32>
    %190 = vector.extract_strided_slice %189 {offsets = [0, 0], sizes = [8, 32], strides = [1, 1]} : vector<8x96xf32> to vector<8x32xf32>
    %191 = vector.extract_strided_slice %189 {offsets = [0, 32], sizes = [8, 32], strides = [1, 1]} : vector<8x96xf32> to vector<8x32xf32>
    %192 = vector.extract_strided_slice %189 {offsets = [0, 64], sizes = [8, 32], strides = [1, 1]} : vector<8x96xf32> to vector<8x32xf32>
    %193 = vector.extract_strided_slice %184 {offsets = [0, 96], sizes = [8, 32], strides = [1, 1]} : vector<8x128xf32> to vector<8x32xf32>
    %194 = arith.mulf %191, %158 : vector<8x32xf32>
    %195 = arith.mulf %190, %193 : vector<8x32xf32>
    %196 = arith.addf %194, %195 : vector<8x32xf32>
    %197 = math.tanh %196 : vector<8x32xf32>
    %198 = arith.mulf %192, %197 : vector<8x32xf32>
    %c5 = arith.constant 5 : index
    %c0_48 = arith.constant 0 : index
    %c0_49 = arith.constant 0 : index
    %199 = vector.load %arg0[%c5, %c0_48, %c0_49] : memref<8x8x32xf32, #tpu.memory_space<vmem>>, vector<1x8x32xf32>
    %200 = vector.shape_cast %199 : vector<1x8x32xf32> to vector<8x32xf32>
    %201 = tpu.concatenate %200, %180 in 1 : vector<8x32xf32>, vector<8x32xf32> -> vector<8x64xf32>
    %cst_50 = arith.constant dense<0.000000e+00> : vector<8x128xf32>
    %202 = tpu.matmul %201, %0, %cst_50 {dimension_numbers = #tpu.dot_dimension_numbers<[1], [0], [0], [1], [0, 0, 1, 1], [], []>} : vector<8x64xf32>, vector<64x128xf32>, vector<8x128xf32> -> vector<8x128xf32>
    %203 = arith.addf %202, %4 : vector<8x128xf32>
    %204 = math.tanh %203 : vector<8x128xf32>
    %205 = vector.extract_strided_slice %204 {offsets = [0, 0], sizes = [8, 96], strides = [1, 1]} : vector<8x128xf32> to vector<8x96xf32>
    %cst_51 = arith.constant 5.000000e-01 : f32
    %206 = vector.broadcast %cst_51 : f32 to vector<8x96xf32>
    %207 = arith.mulf %205, %206 : vector<8x96xf32>
    %cst_52 = arith.constant 5.000000e-01 : f32
    %208 = vector.broadcast %cst_52 : f32 to vector<8x96xf32>
    %209 = arith.addf %207, %208 : vector<8x96xf32>
    %210 = vector.extract_strided_slice %209 {offsets = [0, 0], sizes = [8, 32], strides = [1, 1]} : vector<8x96xf32> to vector<8x32xf32>
    %211 = vector.extract_strided_slice %209 {offsets = [0, 32], sizes = [8, 32], strides = [1, 1]} : vector<8x96xf32> to vector<8x32xf32>
    %212 = vector.extract_strided_slice %209 {offsets = [0, 64], sizes = [8, 32], strides = [1, 1]} : vector<8x96xf32> to vector<8x32xf32>
    %213 = vector.extract_strided_slice %204 {offsets = [0, 96], sizes = [8, 32], strides = [1, 1]} : vector<8x128xf32> to vector<8x32xf32>
    %214 = arith.mulf %211, %178 : vector<8x32xf32>
    %215 = arith.mulf %210, %213 : vector<8x32xf32>
    %216 = arith.addf %214, %215 : vector<8x32xf32>
    %217 = math.tanh %216 : vector<8x32xf32>
    %218 = arith.mulf %212, %217 : vector<8x32xf32>
    %219 = tpu.concatenate %218, %198 in 1 : vector<8x32xf32>, vector<8x32xf32> -> vector<8x64xf32>
    %cst_53 = arith.constant dense<0.000000e+00> : vector<8x128xf32>
    %220 = tpu.matmul %219, %1, %cst_53 {dimension_numbers = #tpu.dot_dimension_numbers<[1], [0], [0], [1], [0, 0, 1, 1], [], []>} : vector<8x64xf32>, vector<64x128xf32>, vector<8x128xf32> -> vector<8x128xf32>
    %221 = arith.addf %220, %7 : vector<8x128xf32>
    %222 = math.tanh %221 : vector<8x128xf32>
    %223 = vector.extract_strided_slice %222 {offsets = [0, 0], sizes = [8, 96], strides = [1, 1]} : vector<8x128xf32> to vector<8x96xf32>
    %cst_54 = arith.constant 5.000000e-01 : f32
    %224 = vector.broadcast %cst_54 : f32 to vector<8x96xf32>
    %225 = arith.mulf %223, %224 : vector<8x96xf32>
    %cst_55 = arith.constant 5.000000e-01 : f32
    %226 = vector.broadcast %cst_55 : f32 to vector<8x96xf32>
    %227 = arith.addf %225, %226 : vector<8x96xf32>
    %228 = vector.extract_strided_slice %227 {offsets = [0, 0], sizes = [8, 32], strides = [1, 1]} : vector<8x96xf32> to vector<8x32xf32>
    %229 = vector.extract_strided_slice %227 {offsets = [0, 32], sizes = [8, 32], strides = [1, 1]} : vector<8x96xf32> to vector<8x32xf32>
    %230 = vector.extract_strided_slice %227 {offsets = [0, 64], sizes = [8, 32], strides = [1, 1]} : vector<8x96xf32> to vector<8x32xf32>
    %231 = vector.extract_strided_slice %222 {offsets = [0, 96], sizes = [8, 32], strides = [1, 1]} : vector<8x128xf32> to vector<8x32xf32>
    %232 = arith.mulf %229, %196 : vector<8x32xf32>
    %233 = arith.mulf %228, %231 : vector<8x32xf32>
    %234 = arith.addf %232, %233 : vector<8x32xf32>
    %235 = math.tanh %234 : vector<8x32xf32>
    %236 = arith.mulf %230, %235 : vector<8x32xf32>
    %c6 = arith.constant 6 : index
    %c0_56 = arith.constant 0 : index
    %c0_57 = arith.constant 0 : index
    %237 = vector.load %arg0[%c6, %c0_56, %c0_57] : memref<8x8x32xf32, #tpu.memory_space<vmem>>, vector<1x8x32xf32>
    %238 = vector.shape_cast %237 : vector<1x8x32xf32> to vector<8x32xf32>
    %239 = tpu.concatenate %238, %218 in 1 : vector<8x32xf32>, vector<8x32xf32> -> vector<8x64xf32>
    %cst_58 = arith.constant dense<0.000000e+00> : vector<8x128xf32>
    %240 = tpu.matmul %239, %0, %cst_58 {dimension_numbers = #tpu.dot_dimension_numbers<[1], [0], [0], [1], [0, 0, 1, 1], [], []>} : vector<8x64xf32>, vector<64x128xf32>, vector<8x128xf32> -> vector<8x128xf32>
    %241 = arith.addf %240, %4 : vector<8x128xf32>
    %242 = math.tanh %241 : vector<8x128xf32>
    %243 = vector.extract_strided_slice %242 {offsets = [0, 0], sizes = [8, 96], strides = [1, 1]} : vector<8x128xf32> to vector<8x96xf32>
    %cst_59 = arith.constant 5.000000e-01 : f32
    %244 = vector.broadcast %cst_59 : f32 to vector<8x96xf32>
    %245 = arith.mulf %243, %244 : vector<8x96xf32>
    %cst_60 = arith.constant 5.000000e-01 : f32
    %246 = vector.broadcast %cst_60 : f32 to vector<8x96xf32>
    %247 = arith.addf %245, %246 : vector<8x96xf32>
    %248 = vector.extract_strided_slice %247 {offsets = [0, 0], sizes = [8, 32], strides = [1, 1]} : vector<8x96xf32> to vector<8x32xf32>
    %249 = vector.extract_strided_slice %247 {offsets = [0, 32], sizes = [8, 32], strides = [1, 1]} : vector<8x96xf32> to vector<8x32xf32>
    %250 = vector.extract_strided_slice %247 {offsets = [0, 64], sizes = [8, 32], strides = [1, 1]} : vector<8x96xf32> to vector<8x32xf32>
    %251 = vector.extract_strided_slice %242 {offsets = [0, 96], sizes = [8, 32], strides = [1, 1]} : vector<8x128xf32> to vector<8x32xf32>
    %252 = arith.mulf %249, %216 : vector<8x32xf32>
    %253 = arith.mulf %248, %251 : vector<8x32xf32>
    %254 = arith.addf %252, %253 : vector<8x32xf32>
    %255 = math.tanh %254 : vector<8x32xf32>
    %256 = arith.mulf %250, %255 : vector<8x32xf32>
    %257 = tpu.concatenate %256, %236 in 1 : vector<8x32xf32>, vector<8x32xf32> -> vector<8x64xf32>
    %cst_61 = arith.constant dense<0.000000e+00> : vector<8x128xf32>
    %258 = tpu.matmul %257, %1, %cst_61 {dimension_numbers = #tpu.dot_dimension_numbers<[1], [0], [0], [1], [0, 0, 1, 1], [], []>} : vector<8x64xf32>, vector<64x128xf32>, vector<8x128xf32> -> vector<8x128xf32>
    %259 = arith.addf %258, %7 : vector<8x128xf32>
    %260 = math.tanh %259 : vector<8x128xf32>
    %261 = vector.extract_strided_slice %260 {offsets = [0, 0], sizes = [8, 96], strides = [1, 1]} : vector<8x128xf32> to vector<8x96xf32>
    %cst_62 = arith.constant 5.000000e-01 : f32
    %262 = vector.broadcast %cst_62 : f32 to vector<8x96xf32>
    %263 = arith.mulf %261, %262 : vector<8x96xf32>
    %cst_63 = arith.constant 5.000000e-01 : f32
    %264 = vector.broadcast %cst_63 : f32 to vector<8x96xf32>
    %265 = arith.addf %263, %264 : vector<8x96xf32>
    %266 = vector.extract_strided_slice %265 {offsets = [0, 0], sizes = [8, 32], strides = [1, 1]} : vector<8x96xf32> to vector<8x32xf32>
    %267 = vector.extract_strided_slice %265 {offsets = [0, 32], sizes = [8, 32], strides = [1, 1]} : vector<8x96xf32> to vector<8x32xf32>
    %268 = vector.extract_strided_slice %265 {offsets = [0, 64], sizes = [8, 32], strides = [1, 1]} : vector<8x96xf32> to vector<8x32xf32>
    %269 = vector.extract_strided_slice %260 {offsets = [0, 96], sizes = [8, 32], strides = [1, 1]} : vector<8x128xf32> to vector<8x32xf32>
    %270 = arith.mulf %267, %234 : vector<8x32xf32>
    %271 = arith.mulf %266, %269 : vector<8x32xf32>
    %272 = arith.addf %270, %271 : vector<8x32xf32>
    %273 = math.tanh %272 : vector<8x32xf32>
    %274 = arith.mulf %268, %273 : vector<8x32xf32>
    %c7 = arith.constant 7 : index
    %c0_64 = arith.constant 0 : index
    %c0_65 = arith.constant 0 : index
    %275 = vector.load %arg0[%c7, %c0_64, %c0_65] : memref<8x8x32xf32, #tpu.memory_space<vmem>>, vector<1x8x32xf32>
    %276 = vector.shape_cast %275 : vector<1x8x32xf32> to vector<8x32xf32>
    %277 = tpu.concatenate %276, %256 in 1 : vector<8x32xf32>, vector<8x32xf32> -> vector<8x64xf32>
    %cst_66 = arith.constant dense<0.000000e+00> : vector<8x128xf32>
    %278 = tpu.matmul %277, %0, %cst_66 {dimension_numbers = #tpu.dot_dimension_numbers<[1], [0], [0], [1], [0, 0, 1, 1], [], []>} : vector<8x64xf32>, vector<64x128xf32>, vector<8x128xf32> -> vector<8x128xf32>
    %279 = arith.addf %278, %4 : vector<8x128xf32>
    %280 = math.tanh %279 : vector<8x128xf32>
    %281 = vector.extract_strided_slice %280 {offsets = [0, 0], sizes = [8, 96], strides = [1, 1]} : vector<8x128xf32> to vector<8x96xf32>
    %cst_67 = arith.constant 5.000000e-01 : f32
    %282 = vector.broadcast %cst_67 : f32 to vector<8x96xf32>
    %283 = arith.mulf %281, %282 : vector<8x96xf32>
    %cst_68 = arith.constant 5.000000e-01 : f32
    %284 = vector.broadcast %cst_68 : f32 to vector<8x96xf32>
    %285 = arith.addf %283, %284 : vector<8x96xf32>
    %286 = vector.extract_strided_slice %285 {offsets = [0, 0], sizes = [8, 32], strides = [1, 1]} : vector<8x96xf32> to vector<8x32xf32>
    %287 = vector.extract_strided_slice %285 {offsets = [0, 32], sizes = [8, 32], strides = [1, 1]} : vector<8x96xf32> to vector<8x32xf32>
    %288 = vector.extract_strided_slice %285 {offsets = [0, 64], sizes = [8, 32], strides = [1, 1]} : vector<8x96xf32> to vector<8x32xf32>
    %289 = vector.extract_strided_slice %280 {offsets = [0, 96], sizes = [8, 32], strides = [1, 1]} : vector<8x128xf32> to vector<8x32xf32>
    %290 = arith.mulf %287, %254 : vector<8x32xf32>
    %291 = arith.mulf %286, %289 : vector<8x32xf32>
    %292 = arith.addf %290, %291 : vector<8x32xf32>
    %293 = math.tanh %292 : vector<8x32xf32>
    %294 = arith.mulf %288, %293 : vector<8x32xf32>
    %295 = tpu.concatenate %294, %274 in 1 : vector<8x32xf32>, vector<8x32xf32> -> vector<8x64xf32>
    %cst_69 = arith.constant dense<0.000000e+00> : vector<8x128xf32>
    %296 = tpu.matmul %295, %1, %cst_69 {dimension_numbers = #tpu.dot_dimension_numbers<[1], [0], [0], [1], [0, 0, 1, 1], [], []>} : vector<8x64xf32>, vector<64x128xf32>, vector<8x128xf32> -> vector<8x128xf32>
    %297 = arith.addf %296, %7 : vector<8x128xf32>
    %298 = math.tanh %297 : vector<8x128xf32>
    %299 = vector.extract_strided_slice %298 {offsets = [0, 0], sizes = [8, 96], strides = [1, 1]} : vector<8x128xf32> to vector<8x96xf32>
    %cst_70 = arith.constant 5.000000e-01 : f32
    %300 = vector.broadcast %cst_70 : f32 to vector<8x96xf32>
    %301 = arith.mulf %299, %300 : vector<8x96xf32>
    %cst_71 = arith.constant 5.000000e-01 : f32
    %302 = vector.broadcast %cst_71 : f32 to vector<8x96xf32>
    %303 = arith.addf %301, %302 : vector<8x96xf32>
    %304 = vector.extract_strided_slice %303 {offsets = [0, 0], sizes = [8, 32], strides = [1, 1]} : vector<8x96xf32> to vector<8x32xf32>
    %305 = vector.extract_strided_slice %303 {offsets = [0, 32], sizes = [8, 32], strides = [1, 1]} : vector<8x96xf32> to vector<8x32xf32>
    %306 = vector.extract_strided_slice %303 {offsets = [0, 64], sizes = [8, 32], strides = [1, 1]} : vector<8x96xf32> to vector<8x32xf32>
    %307 = vector.extract_strided_slice %298 {offsets = [0, 96], sizes = [8, 32], strides = [1, 1]} : vector<8x128xf32> to vector<8x32xf32>
    %308 = arith.mulf %305, %272 : vector<8x32xf32>
    %309 = arith.mulf %304, %307 : vector<8x32xf32>
    %310 = arith.addf %308, %309 : vector<8x32xf32>
    %311 = math.tanh %310 : vector<8x32xf32>
    %312 = arith.mulf %306, %311 : vector<8x32xf32>
    %c0_72 = arith.constant 0 : index
    %c0_73 = arith.constant 0 : index
    %313 = vector.load %arg5[%c0_72, %c0_73] : memref<8x32xf32, #tpu.memory_space<vmem>>, vector<8x32xf32>
    tpu.vector_store %arg5[%c0_72, %c0_73], %312 {strides = array<i32>} : memref<8x32xf32, #tpu.memory_space<vmem>>, vector<8x32xf32>,
    return
  }
}

</mosaic_0001>

<bundles_post_ra>
// kernel: tpu_custom_call.1
= control target key start
LH: loop header
LB: loop body
LE: loop exit
PB: predicated region body
PF: predicated region fallthrough
CT: control target
= control target key end

     0   :  { %10 = vsyncpa [#allocation3], 0  ;;  %s2999_s0 = inlined_call_operand.hbm [shape: f32[8,8,32], index: 0, kind: input, shape index: {}]   ;;  %s3000_s1 = inlined_call_operand.hbm [shape: f32[64,128], index: 1, kind: input, shape index: {}]   ;;  %s3001_s2 = inlined_call_operand.vmem [shape: f32[1,128], index: 2, kind: input, shape index: {}]   ;;  %s3002_s3 = inlined_call_operand.hbm [shape: f32[64,128], index: 3, kind: input, shape index: {}]   ;;  %s3003_s4 = inlined_call_operand.vmem [shape: f32[1,128], index: 4, kind: input, shape index: {}]   ;;  %s3004_s5 = inlined_call_operand.hbm [shape: f32[8,32], index: 5, kind: output, shape index: {}]  }
   0x1   :  { %11 = vsyncpa [#allocation6], 0 }
   0x2   :  { %12 = vsyncpa [#allocation4], 0  ;;  %s2543_s18 = smov [#allocation5]   ;;  %s2544_s20 = smov [#allocation2]  }
   0x3   :  { %s30_s19 = sshll.u32 %s2543_s18, 4  ;;  %s18_s21 = sshll.u32 %s2544_s20, 4  ;;  %s31_s19 = int_to_ptr.vmem [resolvable:$true] %s30_s19  ;;  %s2585_s21 = int_to_ptr.vmem [resolvable:$true] %s18_s21 }
   0x4   :  { %s2449_s24 = scalar_lea.hbm %s3000_s1, 1024 }
   0x5   :  { %p2450_p0 = scmp.ne.s32.totalorder %s3000_s1, %s2449_s24  ;;  %p2453_p1 = scmp.lt.u32.totalorder %s2449_s24, %s3000_s1 }
   0x7   :  { %p2455_p2 = pnand %p2453_p1, %p2450_p0 }
   0x9   :  { %2458 = shalt.err (!%p2455_p2)
}
   0xa   :  { %s2459_s29 = scalar_lea.vmem %s31_s19, 1024  ;;  %p2464_p4 = scmp.lt.s32.totalorder %s31_s19, %s31_s19 }
   0xb   :  { %p2460_p3 = scmp.ne.s32.totalorder %s31_s19, %s2459_s29  ;;  %p2465_p5 = scmp.lt.s32.totalorder %s2459_s29, %s2459_s29 }
   0xd   :  { %p2466_p6 = por %p2465_p5, %p2464_p4 }
   0xf   :  { %p2467_p7 = pnand %p2466_p6, %p2460_p3 }
  0x11   :  { %2470 = shalt.err (!%p2467_p7)
}
  0x12   :  { %s2545_s30 = smov 128   ;;  %s2546_s6 = smov 8  }
  0x13   :  { %36 = dma.hbm_to_vmem [thread:$0]  %s3000_s1, 1024, %s31_s19, [#allocation6], %s2545_s30, %s2545_s30, %s2546_s6  }
  0x14   :  { %s2471_s11 = scalar_lea.hbm %s2999_s0, 1024 }
  0x15   :  { %p2472_p8 = scmp.ne.s32.totalorder %s2999_s0, %s2471_s11  ;;  %p2475_p9 = scmp.lt.u32.totalorder %s2471_s11, %s2999_s0 }
  0x17   :  { %p2477_p10 = pnand %p2475_p9, %p2472_p8 }
  0x19   :  { %2480 = shalt.err (!%p2477_p10)
}
  0x1a   :  { %s2481_s16 = scalar_lea.vmem %s2585_s21, 1024  ;;  %p2486_p12 = scmp.lt.s32.totalorder %s2585_s21, %s2585_s21 }
  0x1b   :  { %p2482_p11 = scmp.ne.s32.totalorder %s2585_s21, %s2481_s16  ;;  %p2487_p13 = scmp.lt.s32.totalorder %s2481_s16, %s2481_s16 }
  0x1d   :  { %p2488_p0 = por %p2487_p13, %p2486_p12 }
  0x1f   :  { %p2489_p1 = pnand %p2488_p0, %p2482_p11 }
  0x21   :  { %2492 = shalt.err (!%p2489_p1)
}
  0x22   :  { %24 = dma.hbm_to_vmem [thread:$0]  %s2999_s0, 1024, %s2585_s21, [#allocation3], %s2545_s30, %s2545_s30, %s2546_s6  }
  0x23   :  { %s2547_s18 = smov [#allocation7]   ;;  %s2493_s23 = scalar_lea.hbm %s3002_s3, 1024 }
  0x24   :  { %s44_s19 = sshll.u32 %s2547_s18, 4  ;;  %p2494_p2 = scmp.ne.s32.totalorder %s3002_s3, %s2493_s23  ;;  %s45_s19 = int_to_ptr.vmem [resolvable:$true] %s44_s19 }
  0x25   :  { %p2497_p3 = scmp.lt.u32.totalorder %s2493_s23, %s3002_s3 }
  0x27   :  { %p2499_p4 = pnand %p2497_p3, %p2494_p2 }
  0x29   :  { %2502 = shalt.err (!%p2499_p4)
}
  0x2a   :  { %s2503_s28 = scalar_lea.vmem %s45_s19, 1024  ;;  %p2508_p6 = scmp.lt.s32.totalorder %s45_s19, %s45_s19 }
  0x2b   :  { %p2504_p5 = scmp.ne.s32.totalorder %s45_s19, %s2503_s28  ;;  %p2509_p7 = scmp.lt.s32.totalorder %s2503_s28, %s2503_s28 }
  0x2d   :  { %p2510_p8 = por %p2509_p7, %p2508_p6 }
  0x2f   :  { %p2511_p9 = pnand %p2510_p8, %p2504_p5 }
  0x31   :  { %2514 = shalt.err (!%p2511_p9)
}
  0x32   :  { %50 = dma.hbm_to_vmem [thread:$0]  %s3002_s3, 1024, %s45_s19, [#allocation6], %s2545_s30, %s2545_s30, %s2546_s6  }
  0x33   :  { %2537 = dma.done.wait [#allocation3], 1024  }
  0x34   :  { %2538 = vsyncadd [#allocation3], 4294966272 }
  0x35   :  { %2539 = dma.done.wait [#allocation6], 2048  }
  0x36   :  { %2540 = vsyncadd [#allocation6], 4294965248  ;;  %v2548_v0 = vmov 0.0|0.0   ;;  %vm2549_vm0 = vmmov 0   ;;  %v2550_v1 = vmov 0.0   ;;  %v62_v2 = vld [vmem:[#allocation5] sm:$0xff] }
  0x37   :  { %2181 = vmatprep.subr.bf16.mxu0 %v2548_v0  ;;  %1893 = vmatprep.mubr.msk.f32.mxu0 %vm2549_vm0, %v2550_v1  ;;  %v63_v3 = vld [vmem:[#allocation5 + $0x8] sm:$0xff]  ;;  %v64_v4 = vld [vmem:[#allocation5 + $0x10] sm:$0xff]  ;;  %v65_v6 = vld [vmem:[#allocation5 + $0x18] sm:$0xff]  ;;  %vm93_vm1 = vcmask 261120   ;;  %vm95_vm2 = vcmask 523264   ;;  %s2551_s30 = smov 32  }
  0x38   :  { %2193 = vmatprep.subr.bf16.mxu1 %v2548_v0  ;;  %1912 = vmatprep.mubr.msk.f32.mxu1 %vm2549_vm0, %v2550_v1  ;;  %v2643_v5 = vpack.c.bf16 %v63_v3, %v62_v2  ;;  %v2646_v7 = vpack.c.bf16 %v65_v6, %v64_v4  ;;  %v66_v8 = vld [vmem:[#allocation5 + $0x20] sm:$0xff]  ;;  %v67_v9 = vld [vmem:[#allocation5 + $0x28] sm:$0xff]  ;;  %v68_v11 = vld [vmem:[#allocation5 + $0x30] sm:$0xff]  ;;  %s2553_s6 = smov 64  }
  0x39   :  { %v2650_v10 = vpack.c.bf16 %v67_v9, %v66_v8  ;;  %v69_v12 = vld [vmem:[#allocation5 + $0x38] sm:$0xff]  ;;  %v92_v14 = vld [vmem:[#allocation2] sm:$0xff]  ;;  %v71_v29 = vld [vmem:[#allocation7 + $0x8] sm:$0xff] }
  0x3a   :  { %2183 = vmatpush3.bf16.msra.mxu0 %v2643_v5  ;;  %v2654_v13 = vpack.c.bf16 %v69_v12, %v68_v11  ;;  %v94_v15 = vsel %vm93_vm1, %v92_v14, 0.0  ;;  %v2674_v16 = vld [vmem:[%s3001_s2] ss:$0 sm:$0xff]  ;;  %v72_v30 = vld [vmem:[#allocation7 + $0x10] sm:$0xff]  ;;  %v73_v32 = vld [vmem:[#allocation7 + $0x18] sm:$0xff]  ;;  %s2552_s2 = smov 96  }
  0x3b   :  { %2184 = vmatprep.subr.bf16.mxu0 %v2548_v0  ;;  %v70_v28 = vld [vmem:[#allocation7] sm:$0xff]  ;;  %v2685_v33 = vpack.c.bf16 %v73_v32, %v72_v30  ;;  %v75_v35 = vld [vmem:[#allocation7 + $0x28] sm:$0xff]  ;;  %v76_v37 = vld [vmem:[#allocation7 + $0x30] sm:$0xff] }
  0x3c   :  { %v2682_v31 = vpack.c.bf16 %v71_v29, %v70_v28  ;;  %v74_v34 = vld [vmem:[#allocation7 + $0x20] sm:$0xff]  ;;  %v77_v38 = vld [vmem:[#allocation7 + $0x38] sm:$0xff]  ;;  %v288_v43 = vld [vmem:[#allocation2 + $0x8] sm:$0xff] }
  0x3d   :  { %v2689_v36 = vpack.c.bf16 %v75_v35, %v74_v34  ;;  %v2694_v40 = vpack.c.bf16 %v77_v38, %v76_v37  ;;  %v2728_v48 = vld [vmem:[%s3003_s4] ss:$0 sm:$0xff]  ;;  %s2554_s4 = smov [#allocation8]  }
  0x3e   :  { %2186 = vmatpush3.bf16.msra.mxu0 %v2646_v7  ;;  %2195 = vmatpush3.bf16.msra.mxu1 %v2682_v31  ;;  %s1705_s9 = sshll.u32 %s2554_s4, 4  ;;  %s1706_s9 = int_to_ptr.vmem [resolvable:$true] %s1705_s9 }
  0x3f   :  { %2187 = vmatprep.subr.bf16.mxu0 %v2548_v0  ;;  %2196 = vmatprep.subr.bf16.mxu1 %v2548_v0  ;;  %s2515_s10 = scalar_lea.vmem %s1706_s9, 128  ;;  %p2520_p11 = scmp.lt.s32.totalorder %s1706_s9, %s1706_s9 }
  0x40   :  { %p2516_p10 = scmp.ne.s32.totalorder %s1706_s9, %s2515_s10  ;;  %p2521_p12 = scmp.lt.s32.totalorder %s2515_s10, %s2515_s10 }
  0x42   :  { %2189 = vmatpush3.bf16.msra.mxu0 %v2650_v10  ;;  %2198 = vmatpush3.bf16.msra.mxu1 %v2685_v33  ;;  %p2522_p13 = por %p2521_p12, %p2520_p11 }
  0x43   :  { %2190 = vmatprep.subr.bf16.mxu0 %v2548_v0  ;;  %2199 = vmatprep.subr.bf16.mxu1 %v2548_v0 }
  0x44   :  { %p2523_p0 = pnand %p2522_p13, %p2516_p10 }
  0x46   :  { %2192 = vmatpush3.bf16.msra.mxu0 %v2654_v13  ;;  %2201 = vmatpush3.bf16.msra.mxu1 %v2689_v36 }
  0x47   :  { %2205 = vmatprep.subr.bf16.mxu0 %v2548_v0  ;;  %2202 = vmatprep.subr.bf16.mxu1 %v2548_v0 }
  0x49   :  { %1894 = vmatmul.mubr.msk.f32.vlgmr.msra.gmra.mrb[0].mxu0 %vm95_vm2, %v94_v15 }
  0x4a   :  { %2207 = vmatpush3.bf16.msra.mxu0 %v2643_v5  ;;  %1931 = vmatprep.mubr.msk.f32.mxu0 %vm2549_vm0, %v2550_v1 }
  0x4b   :  { %2208 = vmatprep.subr.bf16.mxu0 %v2548_v0  ;;  %2204 = vmatpush3.bf16.msra.mxu1 %v2694_v40 }
  0x4c   :  { %2217 = vmatprep.subr.bf16.mxu1 %v2548_v0 }
  0x4e   :  { %2210 = vmatpush3.bf16.msra.mxu0 %v2646_v7 }
  0x4f   :  { %2211 = vmatprep.subr.bf16.mxu0 %v2548_v0 }
  0x52   :  { %2213 = vmatpush3.bf16.msra.mxu0 %v2650_v10 }
  0x53   :  { %2214 = vmatprep.subr.bf16.mxu0 %v2548_v0 }
  0x56   :  { %2216 = vmatpush3.bf16.msra.mxu0 %v2654_v13 }
  0x57   :  { %2229 = vmatprep.subr.bf16.mxu0 %v2548_v0 }
 0x11c   :  { %v165_v17 = vpop.f32.mrb[0].mxu0 }
 0x11d   :  { %v166_v18 = vadd.f32 %v2674_v16, %v165_v17  ;;  %v1895_v19 = vpop.f32.mrb[1].mxu0 }
 0x11f   :  { %2385 = vtanh.f32 %v166_v18 }
 0x129   :  { %v2386_v20 = vpop.eup %2385 }
 0x12a   :  { %174 = vrot.lane.b32.xlu0 %v2386_v20, %s2551_s30  ;;  %v170_v21 = vmul.f32 0.5, %v2386_v20 }
 0x12c   :  { %v171_v22 = vadd.f32 0.5, %v170_v21 }
 0x12e   :  { %v172_v25 = vmul.f32 0.0, %v171_v22 }
 0x19c   :  { %v175_v23 = vpop.permute.xlu0 %174 }
 0x19d   :  { %v177_v24 = vmul.f32 %v175_v23, %v171_v22  ;;  %v489_v23 = vld [vmem:[#allocation2 + $0x10] sm:$0xff] }
 0x19f   :  { %179 = vrot.lane.b32.xlu0 %v177_v24, %s2551_s30 }
 0x211   :  { %v180_v26 = vpop.permute.xlu0 %179 }
 0x212   :  { %v2679_v27 = vadd.f32 %v180_v26, %v172_v25 }
 0x214   :  { %2387 = vtanh.f32 %v2679_v27 }
 0x21e   :  { %v2388_v39 = vpop.eup %2387 }
 0x21f   :  { %185 = vrot.lane.b32.xlu1 %v2388_v39, %s2551_s30 }
 0x291   :  { %v186_v41 = vpop.permute.xlu1 %185 }
 0x292   :  { %v188_v42 = vmul.f32 %v186_v41, %v171_v22 }
 0x294   :  { %289 = vrot.lane.b32.xlu0 %v188_v42, %s2552_s2  ;;  %190 = vrot.lane.b32.xlu1 %v188_v42, %s2553_s6 }
 0x306   :  { %v290_v44 = vpop.permute.xlu0 %289  ;;  %v191_v45 = vpop.permute.xlu1 %190 }
 0x307   :  { %v292_v46 = vsel %vm93_vm1, %v288_v43, %v290_v44  ;;  %v193_v47 = vsel %vm93_vm1, %v191_v45, 0.0 }
 0x308   :  { %1913 = vmatmul.mubr.msk.f32.vlgmr.msra.gmra.mrb[0].mxu1 %vm95_vm2, %v193_v47  ;;  %1932 = vmatmul.mubr.msk.f32.vlgmr.msra.gmra.mrb[2].mxu0 %vm95_vm2, %v292_v46 }
 0x309   :  { %2219 = vmatpush3.bf16.msra.mxu1 %v2682_v31  ;;  %2231 = vmatpush3.bf16.msra.mxu0 %v2643_v5 }
 0x30a   :  { %2220 = vmatprep.subr.bf16.mxu1 %v2548_v0  ;;  %2232 = vmatprep.subr.bf16.mxu0 %v2548_v0 }
 0x30b   :  { %1950 = vmatprep.mubr.msk.f32.mxu1 %vm2549_vm0, %v2550_v1  ;;  %1969 = vmatprep.mubr.msk.f32.mxu0 %vm2549_vm0, %v2550_v1 }
 0x30d   :  { %2222 = vmatpush3.bf16.msra.mxu1 %v2685_v33  ;;  %2234 = vmatpush3.bf16.msra.mxu0 %v2646_v7 }
 0x30e   :  { %2223 = vmatprep.subr.bf16.mxu1 %v2548_v0  ;;  %2235 = vmatprep.subr.bf16.mxu0 %v2548_v0 }
 0x311   :  { %2225 = vmatpush3.bf16.msra.mxu1 %v2689_v36  ;;  %2237 = vmatpush3.bf16.msra.mxu0 %v2650_v10 }
 0x312   :  { %2226 = vmatprep.subr.bf16.mxu1 %v2548_v0  ;;  %2238 = vmatprep.subr.bf16.mxu0 %v2548_v0 }
 0x315   :  { %2228 = vmatpush3.bf16.msra.mxu1 %v2694_v40  ;;  %2240 = vmatpush3.bf16.msra.mxu0 %v2654_v13 }
 0x316   :  { %2241 = vmatprep.subr.bf16.mxu1 %v2548_v0  ;;  %2253 = vmatprep.subr.bf16.mxu0 %v2548_v0 }
 0x3db   :  { %v263_v49 = vpop.f32.mrb[0].mxu1  ;;  %v362_v50 = vpop.f32.mrb[2].mxu0 }
 0x3dc   :  { %v264_v51 = vadd.f32 %v2728_v48, %v263_v49  ;;  %v363_v52 = vadd.f32 %v2674_v16, %v362_v50  ;;  %v1914_v53 = vpop.f32.mrb[1].mxu1  ;;  %v1933_v54 = vpop.f32.mrb[3].mxu0 }
 0x3de   :  { %2389 = vtanh.f32 %v264_v51 }
 0x3df   :  { %2391 = vtanh.f32 %v363_v52 }
 0x3e8   :  { %v2390_v55 = vpop.eup %2389 }
 0x3e9   :  { %v2392_v56 = vpop.eup %2391  ;;  %272 = vrot.lane.b32.xlu1 %v2390_v55, %s2551_s30  ;;  %v268_v57 = vmul.f32 0.5, %v2390_v55 }
 0x3ea   :  { %371 = vrot.lane.b32.xlu0 %v2392_v56, %s2551_s30  ;;  %v367_v58 = vmul.f32 0.5, %v2392_v56 }
 0x3eb   :  { %v269_v59 = vadd.f32 0.5, %v268_v57 }
 0x3ec   :  { %v368_v61 = vadd.f32 0.5, %v367_v58 }
 0x3ed   :  { %v270_v3 = vmul.f32 0.0, %v269_v59 }
 0x3ee   :  { %v369_v6 = vmul.f32 %v368_v61, %v2679_v27 }
 0x45b   :  { %v273_v60 = vpop.permute.xlu1 %272 }
 0x45c   :  { %v275_v62 = vmul.f32 %v273_v60, %v269_v59  ;;  %v372_v63 = vpop.permute.xlu0 %371 }
 0x45d   :  { %v374_v2 = vmul.f32 %v372_v63, %v368_v61 }
 0x45e   :  { %277 = vrot.lane.b32.xlu1 %v275_v62, %s2551_s30  ;;  %v690_v62 = vld [vmem:[#allocation2 + $0x18] sm:$0xff] }
 0x45f   :  { %376 = vrot.lane.b32.xlu0 %v374_v2, %s2551_s30 }
 0x4d0   :  { %v278_v4 = vpop.permute.xlu1 %277 }
 0x4d1   :  { %v2737_v8 = vadd.f32 %v278_v4, %v270_v3  ;;  %v377_v9 = vpop.permute.xlu0 %376 }
 0x4d2   :  { %v2739_v11 = vadd.f32 %v377_v9, %v369_v6 }
 0x4d3   :  { %2393 = vtanh.f32 %v2737_v8 }
 0x4d4   :  { %2395 = vtanh.f32 %v2739_v11 }
 0x4dd   :  { %v2394_v12 = vpop.eup %2393 }
 0x4de   :  { %v2396_v14 = vpop.eup %2395  ;;  %283 = vrot.lane.b32.xlu1 %v2394_v12, %s2551_s30 }
 0x4df   :  { %382 = vrot.lane.b32.xlu0 %v2396_v14, %s2551_s30 }
 0x550   :  { %v284_v15 = vpop.permute.xlu1 %283 }
 0x551   :  { %v286_v17 = vmul.f32 %v284_v15, %v269_v59  ;;  %v383_v18 = vpop.permute.xlu0 %382 }
 0x552   :  { %v385_v19 = vmul.f32 %v383_v18, %v368_v61 }
 0x553   :  { %391 = vrot.lane.b32.xlu0 %v286_v17, %s2552_s2 }
 0x554   :  { %387 = vrot.lane.b32.xlu1 %v385_v19, %s2553_s6 }
 0x558   :  { %490 = vrot.lane.b32.xlu1 %v385_v19, %s2552_s2 }
 0x5c5   :  { %v392_v20 = vpop.permute.xlu0 %391 }
 0x5c6   :  { %v388_v21 = vpop.permute.xlu1 %387 }
 0x5c7   :  { %v394_v22 = vsel %vm93_vm1, %v388_v21, %v392_v20 }
 0x5c8   :  { %1951 = vmatmul.mubr.msk.f32.vlgmr.msra.gmra.mrb[2].mxu1 %vm95_vm2, %v394_v22 }
 0x5c9   :  { %2243 = vmatpush3.bf16.msra.mxu1 %v2682_v31  ;;  %1988 = vmatprep.mubr.msk.f32.mxu1 %vm2549_vm0, %v2550_v1 }
 0x5ca   :  { %v491_v24 = vpop.permute.xlu1 %490  ;;  %2244 = vmatprep.subr.bf16.mxu1 %v2548_v0 }
 0x5cb   :  { %v493_v25 = vsel %vm93_vm1, %v489_v23, %v491_v24 }
 0x5cc   :  { %1970 = vmatmul.mubr.msk.f32.vlgmr.msra.gmra.mrb[4].mxu0 %vm95_vm2, %v493_v25 }
 0x5cd   :  { %2246 = vmatpush3.bf16.msra.mxu1 %v2685_v33  ;;  %2255 = vmatpush3.bf16.msra.mxu0 %v2643_v5 }
 0x5ce   :  { %2247 = vmatprep.subr.bf16.mxu1 %v2548_v0  ;;  %2256 = vmatprep.subr.bf16.mxu0 %v2548_v0 }
 0x5cf   :  { %2007 = vmatprep.mubr.msk.f32.mxu0 %vm2549_vm0, %v2550_v1 }
 0x5d1   :  { %2249 = vmatpush3.bf16.msra.mxu1 %v2689_v36  ;;  %2258 = vmatpush3.bf16.msra.mxu0 %v2646_v7 }
 0x5d2   :  { %2250 = vmatprep.subr.bf16.mxu1 %v2548_v0  ;;  %2259 = vmatprep.subr.bf16.mxu0 %v2548_v0 }
 0x5d5   :  { %2252 = vmatpush3.bf16.msra.mxu1 %v2694_v40  ;;  %2261 = vmatpush3.bf16.msra.mxu0 %v2650_v10 }
 0x5d6   :  { %2262 = vmatprep.subr.bf16.mxu0 %v2548_v0  ;;  %2265 = vmatprep.subr.bf16.mxu1 %v2548_v0 }
 0x5d9   :  { %2264 = vmatpush3.bf16.msra.mxu0 %v2654_v13 }
 0x5da   :  { %2277 = vmatprep.subr.bf16.mxu0 %v2548_v0 }
 0x69b   :  { %v464_v26 = vpop.f32.mrb[2].mxu1 }
 0x69c   :  { %v465_v27 = vadd.f32 %v2728_v48, %v464_v26  ;;  %v1952_v28 = vpop.f32.mrb[3].mxu1 }
 0x69e   :  { %2397 = vtanh.f32 %v465_v27 }
 0x69f   :  { %v563_v29 = vpop.f32.mrb[4].mxu0 }
 0x6a0   :  { %v564_v30 = vadd.f32 %v2674_v16, %v563_v29  ;;  %v1971_v32 = vpop.f32.mrb[5].mxu0 }
 0x6a2   :  { %2399 = vtanh.f32 %v564_v30 }
 0x6a8   :  { %v2398_v34 = vpop.eup %2397 }
 0x6a9   :  { %473 = vrot.lane.b32.xlu0 %v2398_v34, %s2551_s30  ;;  %v469_v37 = vmul.f32 0.5, %v2398_v34 }
 0x6ab   :  { %v470_v38 = vadd.f32 0.5, %v469_v37 }
 0x6ac   :  { %v2400_v35 = vpop.eup %2399 }
 0x6ad   :  { %572 = vrot.lane.b32.xlu1 %v2400_v35, %s2551_s30  ;;  %v568_v39 = vmul.f32 0.5, %v2400_v35  ;;  %v471_v46 = vmul.f32 %v470_v38, %v2737_v8 }
 0x6af   :  { %v569_v43 = vadd.f32 0.5, %v568_v39 }
 0x6b1   :  { %v570_v50 = vmul.f32 %v569_v43, %v2739_v11 }
 0x71b   :  { %v474_v41 = vpop.permute.xlu0 %473 }
 0x71c   :  { %v476_v42 = vmul.f32 %v474_v41, %v470_v38 }
 0x71e   :  { %478 = vrot.lane.b32.xlu0 %v476_v42, %s2551_s30 }
 0x71f   :  { %v573_v44 = vpop.permute.xlu1 %572 }
 0x720   :  { %v575_v45 = vmul.f32 %v573_v44, %v569_v43 }
 0x722   :  { %577 = vrot.lane.b32.xlu1 %v575_v45, %s2551_s30 }
 0x790   :  { %v479_v47 = vpop.permute.xlu0 %478 }
 0x791   :  { %v2779_v49 = vadd.f32 %v479_v47, %v471_v46 }
 0x793   :  { %2401 = vtanh.f32 %v2779_v49 }
 0x794   :  { %v578_v51 = vpop.permute.xlu1 %577 }
 0x795   :  { %v2783_v52 = vadd.f32 %v578_v51, %v570_v50 }
 0x797   :  { %2403 = vtanh.f32 %v2783_v52 }
 0x79d   :  { %v2402_v53 = vpop.eup %2401 }
 0x79e   :  { %484 = vrot.lane.b32.xlu0 %v2402_v53, %s2551_s30 }
 0x7a1   :  { %v2404_v54 = vpop.eup %2403 }
 0x7a2   :  { %583 = vrot.lane.b32.xlu1 %v2404_v54, %s2551_s30 }
 0x810   :  { %v485_v55 = vpop.permute.xlu0 %484 }
 0x811   :  { %v487_v56 = vmul.f32 %v485_v55, %v470_v38 }
 0x813   :  { %592 = vrot.lane.b32.xlu1 %v487_v56, %s2552_s2 }
 0x814   :  { %v584_v57 = vpop.permute.xlu1 %583 }
 0x815   :  { %v586_v58 = vmul.f32 %v584_v57, %v569_v43  ;;  %v891_v43 = vld [vmem:[#allocation2 + $0x20] sm:$0xff] }
 0x817   :  { %588 = vrot.lane.b32.xlu0 %v586_v58, %s2553_s6 }
 0x81b   :  { %691 = vrot.lane.b32.xlu0 %v586_v58, %s2552_s2 }
 0x885   :  { %v593_v59 = vpop.permute.xlu1 %592 }
 0x889   :  { %v589_v60 = vpop.permute.xlu0 %588 }
 0x88a   :  { %v595_v61 = vsel %vm93_vm1, %v589_v60, %v593_v59 }
 0x88b   :  { %1989 = vmatmul.mubr.msk.f32.vlgmr.msra.gmra.mrb[4].mxu1 %vm95_vm2, %v595_v61 }
 0x88c   :  { %2267 = vmatpush3.bf16.msra.mxu1 %v2682_v31  ;;  %2026 = vmatprep.mubr.msk.f32.mxu1 %vm2549_vm0, %v2550_v1 }
 0x88d   :  { %v692_v63 = vpop.permute.xlu0 %691  ;;  %2268 = vmatprep.subr.bf16.mxu1 %v2548_v0 }
 0x88e   :  { %v694_v2 = vsel %vm93_vm1, %v690_v62, %v692_v63 }
 0x88f   :  { %2008 = vmatmul.mubr.msk.f32.vlgmr.msra.gmra.mrb[6].mxu0 %vm95_vm2, %v694_v2 }
 0x890   :  { %2270 = vmatpush3.bf16.msra.mxu1 %v2685_v33  ;;  %2279 = vmatpush3.bf16.msra.mxu0 %v2643_v5 }
 0x891   :  { %2271 = vmatprep.subr.bf16.mxu1 %v2548_v0  ;;  %2280 = vmatprep.subr.bf16.mxu0 %v2548_v0 }
 0x892   :  { %2045 = vmatprep.mubr.msk.f32.mxu0 %vm2549_vm0, %v2550_v1 }
 0x894   :  { %2273 = vmatpush3.bf16.msra.mxu1 %v2689_v36  ;;  %2282 = vmatpush3.bf16.msra.mxu0 %v2646_v7 }
 0x895   :  { %2274 = vmatprep.subr.bf16.mxu1 %v2548_v0  ;;  %2283 = vmatprep.subr.bf16.mxu0 %v2548_v0 }
 0x898   :  { %2276 = vmatpush3.bf16.msra.mxu1 %v2694_v40  ;;  %2285 = vmatpush3.bf16.msra.mxu0 %v2650_v10 }
 0x899   :  { %2286 = vmatprep.subr.bf16.mxu0 %v2548_v0  ;;  %2289 = vmatprep.subr.bf16.mxu1 %v2548_v0 }
 0x89c   :  { %2288 = vmatpush3.bf16.msra.mxu0 %v2654_v13 }
 0x89d   :  { %2301 = vmatprep.subr.bf16.mxu0 %v2548_v0 }
 0x95e   :  { %v665_v3 = vpop.f32.mrb[4].mxu1 }
 0x95f   :  { %v666_v4 = vadd.f32 %v2728_v48, %v665_v3  ;;  %v1990_v6 = vpop.f32.mrb[5].mxu1 }
 0x961   :  { %2405 = vtanh.f32 %v666_v4 }
 0x962   :  { %v764_v8 = vpop.f32.mrb[6].mxu0 }
 0x963   :  { %v765_v9 = vadd.f32 %v2674_v16, %v764_v8  ;;  %v2009_v11 = vpop.f32.mrb[7].mxu0 }
 0x965   :  { %2407 = vtanh.f32 %v765_v9 }
 0x96b   :  { %v2406_v12 = vpop.eup %2405 }
 0x96c   :  { %674 = vrot.lane.b32.xlu1 %v2406_v12, %s2551_s30  ;;  %v670_v15 = vmul.f32 0.5, %v2406_v12 }
 0x96e   :  { %v671_v17 = vadd.f32 0.5, %v670_v15 }
 0x96f   :  { %v2408_v14 = vpop.eup %2407 }
 0x970   :  { %773 = vrot.lane.b32.xlu0 %v2408_v14, %s2551_s30  ;;  %v769_v18 = vmul.f32 0.5, %v2408_v14  ;;  %v672_v24 = vmul.f32 %v671_v17, %v2779_v49 }
 0x972   :  { %v770_v21 = vadd.f32 0.5, %v769_v18 }
 0x974   :  { %v771_v27 = vmul.f32 %v770_v21, %v2783_v52 }
 0x9de   :  { %v675_v19 = vpop.permute.xlu1 %674 }
 0x9df   :  { %v677_v20 = vmul.f32 %v675_v19, %v671_v17 }
 0x9e1   :  { %679 = vrot.lane.b32.xlu1 %v677_v20, %s2551_s30 }
 0x9e2   :  { %v774_v22 = vpop.permute.xlu0 %773 }
 0x9e3   :  { %v776_v23 = vmul.f32 %v774_v22, %v770_v21 }
 0x9e5   :  { %778 = vrot.lane.b32.xlu0 %v776_v23, %s2551_s30 }
 0xa53   :  { %v680_v25 = vpop.permute.xlu1 %679 }
 0xa54   :  { %v2822_v26 = vadd.f32 %v680_v25, %v672_v24 }
 0xa56   :  { %2409 = vtanh.f32 %v2822_v26 }
 0xa57   :  { %v779_v28 = vpop.permute.xlu0 %778 }
 0xa58   :  { %v2826_v29 = vadd.f32 %v779_v28, %v771_v27 }
 0xa5a   :  { %2411 = vtanh.f32 %v2826_v29 }
 0xa60   :  { %v2410_v30 = vpop.eup %2409 }
 0xa61   :  { %685 = vrot.lane.b32.xlu1 %v2410_v30, %s2551_s30 }
 0xa64   :  { %v2412_v32 = vpop.eup %2411 }
 0xa65   :  { %784 = vrot.lane.b32.xlu0 %v2412_v32, %s2551_s30 }
 0xad3   :  { %v686_v34 = vpop.permute.xlu1 %685 }
 0xad4   :  { %v688_v35 = vmul.f32 %v686_v34, %v671_v17 }
 0xad6   :  { %793 = vrot.lane.b32.xlu0 %v688_v35, %s2552_s2 }
 0xad7   :  { %v785_v37 = vpop.permute.xlu0 %784 }
 0xad8   :  { %v787_v38 = vmul.f32 %v785_v37, %v770_v21  ;;  %v1092_v21 = vld [vmem:[#allocation2 + $0x28] sm:$0xff] }
 0xada   :  { %789 = vrot.lane.b32.xlu1 %v787_v38, %s2553_s6 }
 0xade   :  { %892 = vrot.lane.b32.xlu1 %v787_v38, %s2552_s2 }
 0xb48   :  { %v794_v39 = vpop.permute.xlu0 %793 }
 0xb4c   :  { %v790_v41 = vpop.permute.xlu1 %789 }
 0xb4d   :  { %v796_v42 = vsel %vm93_vm1, %v790_v41, %v794_v39 }
 0xb4e   :  { %2027 = vmatmul.mubr.msk.f32.vlgmr.msra.gmra.mrb[6].mxu1 %vm95_vm2, %v796_v42 }
 0xb4f   :  { %2291 = vmatpush3.bf16.msra.mxu1 %v2682_v31  ;;  %2064 = vmatprep.mubr.msk.f32.mxu1 %vm2549_vm0, %v2550_v1 }
 0xb50   :  { %v893_v44 = vpop.permute.xlu1 %892  ;;  %2292 = vmatprep.subr.bf16.mxu1 %v2548_v0 }
 0xb51   :  { %v895_v45 = vsel %vm93_vm1, %v891_v43, %v893_v44 }
 0xb52   :  { %2046 = vmatmul.mubr.msk.f32.vlgmr.msra.gmra.mrb[8].mxu0 %vm95_vm2, %v895_v45 }
 0xb53   :  { %2294 = vmatpush3.bf16.msra.mxu1 %v2685_v33  ;;  %2303 = vmatpush3.bf16.msra.mxu0 %v2643_v5 }
 0xb54   :  { %2295 = vmatprep.subr.bf16.mxu1 %v2548_v0  ;;  %2304 = vmatprep.subr.bf16.mxu0 %v2548_v0 }
 0xb55   :  { %2083 = vmatprep.mubr.msk.f32.mxu0 %vm2549_vm0, %v2550_v1 }
 0xb57   :  { %2297 = vmatpush3.bf16.msra.mxu1 %v2689_v36  ;;  %2306 = vmatpush3.bf16.msra.mxu0 %v2646_v7 }
 0xb58   :  { %2298 = vmatprep.subr.bf16.mxu1 %v2548_v0  ;;  %2307 = vmatprep.subr.bf16.mxu0 %v2548_v0 }
 0xb5b   :  { %2300 = vmatpush3.bf16.msra.mxu1 %v2694_v40  ;;  %2309 = vmatpush3.bf16.msra.mxu0 %v2650_v10 }
 0xb5c   :  { %2310 = vmatprep.subr.bf16.mxu0 %v2548_v0  ;;  %2313 = vmatprep.subr.bf16.mxu1 %v2548_v0 }
 0xb5f   :  { %2312 = vmatpush3.bf16.msra.mxu0 %v2654_v13 }
 0xb60   :  { %2325 = vmatprep.subr.bf16.mxu0 %v2548_v0 }
 0xc21   :  { %v866_v46 = vpop.f32.mrb[6].mxu1 }
 0xc22   :  { %v867_v47 = vadd.f32 %v2728_v48, %v866_v46  ;;  %v2028_v49 = vpop.f32.mrb[7].mxu1 }
 0xc24   :  { %2413 = vtanh.f32 %v867_v47 }
 0xc25   :  { %v965_v50 = vpop.f32.mrb[8].mxu0 }
 0xc26   :  { %v966_v51 = vadd.f32 %v2674_v16, %v965_v50  ;;  %v2047_v52 = vpop.f32.mrb[9].mxu0 }
 0xc28   :  { %2415 = vtanh.f32 %v966_v51 }
 0xc2e   :  { %v2414_v53 = vpop.eup %2413 }
 0xc2f   :  { %875 = vrot.lane.b32.xlu0 %v2414_v53, %s2551_s30  ;;  %v871_v55 = vmul.f32 0.5, %v2414_v53 }
 0xc31   :  { %v872_v56 = vadd.f32 0.5, %v871_v55 }
 0xc32   :  { %v2416_v54 = vpop.eup %2415 }
 0xc33   :  { %974 = vrot.lane.b32.xlu1 %v2416_v54, %s2551_s30  ;;  %v970_v57 = vmul.f32 0.5, %v2416_v54  ;;  %v873_v63 = vmul.f32 %v872_v56, %v2822_v26 }
 0xc35   :  { %v971_v60 = vadd.f32 0.5, %v970_v57 }
 0xc37   :  { %v972_v4 = vmul.f32 %v971_v60, %v2826_v29 }
 0xca1   :  { %v876_v58 = vpop.permute.xlu0 %875 }
 0xca2   :  { %v878_v59 = vmul.f32 %v876_v58, %v872_v56 }
 0xca4   :  { %880 = vrot.lane.b32.xlu0 %v878_v59, %s2551_s30 }
 0xca5   :  { %v975_v61 = vpop.permute.xlu1 %974 }
 0xca6   :  { %v977_v62 = vmul.f32 %v975_v61, %v971_v60 }
 0xca8   :  { %979 = vrot.lane.b32.xlu1 %v977_v62, %s2551_s30 }
 0xd16   :  { %v881_v2 = vpop.permute.xlu0 %880 }
 0xd17   :  { %v2865_v3 = vadd.f32 %v881_v2, %v873_v63 }
 0xd19   :  { %2417 = vtanh.f32 %v2865_v3 }
 0xd1a   :  { %v980_v6 = vpop.permute.xlu1 %979 }
 0xd1b   :  { %v2869_v8 = vadd.f32 %v980_v6, %v972_v4 }
 0xd1d   :  { %2419 = vtanh.f32 %v2869_v8 }
 0xd23   :  { %v2418_v9 = vpop.eup %2417 }
 0xd24   :  { %886 = vrot.lane.b32.xlu0 %v2418_v9, %s2551_s30 }
 0xd27   :  { %v2420_v11 = vpop.eup %2419 }
 0xd28   :  { %985 = vrot.lane.b32.xlu1 %v2420_v11, %s2551_s30 }
 0xd96   :  { %v887_v12 = vpop.permute.xlu0 %886 }
 0xd97   :  { %v889_v14 = vmul.f32 %v887_v12, %v872_v56 }
 0xd99   :  { %994 = vrot.lane.b32.xlu1 %v889_v14, %s2552_s2 }
 0xd9a   :  { %v986_v15 = vpop.permute.xlu1 %985 }
 0xd9b   :  { %v988_v17 = vmul.f32 %v986_v15, %v971_v60  ;;  %v1293_v60 = vld [vmem:[#allocation2 + $0x30] sm:$0xff] }
 0xd9d   :  { %990 = vrot.lane.b32.xlu0 %v988_v17, %s2553_s6 }
 0xda1   :  { %1093 = vrot.lane.b32.xlu0 %v988_v17, %s2552_s2 }
 0xe0b   :  { %v995_v18 = vpop.permute.xlu1 %994 }
 0xe0f   :  { %v991_v19 = vpop.permute.xlu0 %990 }
 0xe10   :  { %v997_v20 = vsel %vm93_vm1, %v991_v19, %v995_v18 }
 0xe11   :  { %2065 = vmatmul.mubr.msk.f32.vlgmr.msra.gmra.mrb[8].mxu1 %vm95_vm2, %v997_v20 }
 0xe12   :  { %2315 = vmatpush3.bf16.msra.mxu1 %v2682_v31  ;;  %2102 = vmatprep.mubr.msk.f32.mxu1 %vm2549_vm0, %v2550_v1 }
 0xe13   :  { %v1094_v22 = vpop.permute.xlu0 %1093  ;;  %2316 = vmatprep.subr.bf16.mxu1 %v2548_v0 }
 0xe14   :  { %v1096_v23 = vsel %vm93_vm1, %v1092_v21, %v1094_v22 }
 0xe15   :  { %2084 = vmatmul.mubr.msk.f32.vlgmr.msra.gmra.mrb[10].mxu0 %vm95_vm2, %v1096_v23 }
 0xe16   :  { %2318 = vmatpush3.bf16.msra.mxu1 %v2685_v33  ;;  %2327 = vmatpush3.bf16.msra.mxu0 %v2643_v5 }
 0xe17   :  { %2319 = vmatprep.subr.bf16.mxu1 %v2548_v0  ;;  %2328 = vmatprep.subr.bf16.mxu0 %v2548_v0 }
 0xe18   :  { %2121 = vmatprep.mubr.msk.f32.mxu0 %vm2549_vm0, %v2550_v1 }
 0xe1a   :  { %2321 = vmatpush3.bf16.msra.mxu1 %v2689_v36  ;;  %2330 = vmatpush3.bf16.msra.mxu0 %v2646_v7 }
 0xe1b   :  { %2322 = vmatprep.subr.bf16.mxu1 %v2548_v0  ;;  %2331 = vmatprep.subr.bf16.mxu0 %v2548_v0 }
 0xe1e   :  { %2324 = vmatpush3.bf16.msra.mxu1 %v2694_v40  ;;  %2333 = vmatpush3.bf16.msra.mxu0 %v2650_v10 }
 0xe1f   :  { %2334 = vmatprep.subr.bf16.mxu0 %v2548_v0  ;;  %2337 = vmatprep.subr.bf16.mxu1 %v2548_v0 }
 0xe22   :  { %2336 = vmatpush3.bf16.msra.mxu0 %v2654_v13 }
 0xe23   :  { %2349 = vmatprep.subr.bf16.mxu0 %v2548_v0 }
 0xee4   :  { %v1067_v24 = vpop.f32.mrb[8].mxu1 }
 0xee5   :  { %v1068_v25 = vadd.f32 %v2728_v48, %v1067_v24  ;;  %v2066_v26 = vpop.f32.mrb[9].mxu1 }
 0xee7   :  { %2421 = vtanh.f32 %v1068_v25 }
 0xee8   :  { %v1166_v27 = vpop.f32.mrb[10].mxu0 }
 0xee9   :  { %v1167_v28 = vadd.f32 %v2674_v16, %v1166_v27  ;;  %v2085_v29 = vpop.f32.mrb[11].mxu0 }
 0xeeb   :  { %2423 = vtanh.f32 %v1167_v28 }
 0xef1   :  { %v2422_v30 = vpop.eup %2421 }
 0xef2   :  { %1076 = vrot.lane.b32.xlu1 %v2422_v30, %s2551_s30  ;;  %v1072_v34 = vmul.f32 0.5, %v2422_v30 }
 0xef4   :  { %v1073_v35 = vadd.f32 0.5, %v1072_v34 }
 0xef5   :  { %v2424_v32 = vpop.eup %2423 }
 0xef6   :  { %1175 = vrot.lane.b32.xlu0 %v2424_v32, %s2551_s30  ;;  %v1171_v37 = vmul.f32 0.5, %v2424_v32  ;;  %v1074_v44 = vmul.f32 %v1073_v35, %v2865_v3 }
 0xef8   :  { %v1172_v41 = vadd.f32 0.5, %v1171_v37 }
 0xefa   :  { %v1173_v47 = vmul.f32 %v1172_v41, %v2869_v8 }
 0xf64   :  { %v1077_v38 = vpop.permute.xlu1 %1076 }
 0xf65   :  { %v1079_v39 = vmul.f32 %v1077_v38, %v1073_v35 }
 0xf67   :  { %1081 = vrot.lane.b32.xlu1 %v1079_v39, %s2551_s30 }
 0xf68   :  { %v1176_v42 = vpop.permute.xlu0 %1175 }
 0xf69   :  { %v1178_v43 = vmul.f32 %v1176_v42, %v1172_v41 }
 0xf6b   :  { %1180 = vrot.lane.b32.xlu0 %v1178_v43, %s2551_s30 }
 0xfd9   :  { %v1082_v45 = vpop.permute.xlu1 %1081 }
 0xfda   :  { %v2908_v46 = vadd.f32 %v1082_v45, %v1074_v44 }
 0xfdc   :  { %2425 = vtanh.f32 %v2908_v46 }
 0xfdd   :  { %v1181_v49 = vpop.permute.xlu0 %1180 }
 0xfde   :  { %v2912_v50 = vadd.f32 %v1181_v49, %v1173_v47 }
 0xfe0   :  { %2427 = vtanh.f32 %v2912_v50 }
 0xfe6   :  { %v2426_v51 = vpop.eup %2425 }
 0xfe7   :  { %1087 = vrot.lane.b32.xlu1 %v2426_v51, %s2551_s30 }
 0xfea   :  { %v2428_v52 = vpop.eup %2427 }
 0xfeb   :  { %1186 = vrot.lane.b32.xlu0 %v2428_v52, %s2551_s30 }
0x1059   :  { %v1088_v53 = vpop.permute.xlu1 %1087 }
0x105a   :  { %v1090_v54 = vmul.f32 %v1088_v53, %v1073_v35  ;;  %v1494_v35 = vld [vmem:[#allocation2 + $0x38] sm:$0xff] }
0x105c   :  { %1195 = vrot.lane.b32.xlu0 %v1090_v54, %s2552_s2 }
0x105d   :  { %v1187_v55 = vpop.permute.xlu0 %1186 }
0x105e   :  { %v1189_v56 = vmul.f32 %v1187_v55, %v1172_v41 }
0x1060   :  { %1191 = vrot.lane.b32.xlu1 %v1189_v56, %s2553_s6 }
0x1064   :  { %1294 = vrot.lane.b32.xlu1 %v1189_v56, %s2552_s2 }
0x10ce   :  { %v1196_v57 = vpop.permute.xlu0 %1195 }
0x10d2   :  { %v1192_v58 = vpop.permute.xlu1 %1191 }
0x10d3   :  { %v1198_v59 = vsel %vm93_vm1, %v1192_v58, %v1196_v57 }
0x10d4   :  { %2103 = vmatmul.mubr.msk.f32.vlgmr.msra.gmra.mrb[10].mxu1 %vm95_vm2, %v1198_v59 }
0x10d5   :  { %2339 = vmatpush3.bf16.msra.mxu1 %v2682_v31  ;;  %2140 = vmatprep.mubr.msk.f32.mxu1 %vm2549_vm0, %v2550_v1 }
0x10d6   :  { %v1295_v61 = vpop.permute.xlu1 %1294  ;;  %2340 = vmatprep.subr.bf16.mxu1 %v2548_v0 }
0x10d7   :  { %v1297_v62 = vsel %vm93_vm1, %v1293_v60, %v1295_v61 }
0x10d8   :  { %2122 = vmatmul.mubr.msk.f32.vlgmr.msra.gmra.mrb[12].mxu0 %vm95_vm2, %v1297_v62 }
0x10d9   :  { %2342 = vmatpush3.bf16.msra.mxu1 %v2685_v33  ;;  %2351 = vmatpush3.bf16.msra.mxu0 %v2643_v5 }
0x10da   :  { %2343 = vmatprep.subr.bf16.mxu1 %v2548_v0  ;;  %2352 = vmatprep.subr.bf16.mxu0 %v2548_v0 }
0x10db   :  { %2159 = vmatprep.mubr.msk.f32.mxu0 %vm2549_vm0, %v2550_v1 }
0x10dd   :  { %2345 = vmatpush3.bf16.msra.mxu1 %v2689_v36  ;;  %2354 = vmatpush3.bf16.msra.mxu0 %v2646_v7 }
0x10de   :  { %2346 = vmatprep.subr.bf16.mxu1 %v2548_v0  ;;  %2355 = vmatprep.subr.bf16.mxu0 %v2548_v0 }
0x10e1   :  { %2348 = vmatpush3.bf16.msra.mxu1 %v2694_v40  ;;  %2357 = vmatpush3.bf16.msra.mxu0 %v2650_v10 }
0x10e2   :  { %2358 = vmatprep.subr.bf16.mxu0 %v2548_v0  ;;  %2361 = vmatprep.subr.bf16.mxu1 %v2548_v0 }
0x10e5   :  { %2360 = vmatpush3.bf16.msra.mxu0 %v2654_v13 }
0x11a7   :  { %v1268_v5 = vpop.f32.mrb[10].mxu1 }
0x11a8   :  { %v1269_v63 = vadd.f32 %v2728_v48, %v1268_v5  ;;  %v2104_v2 = vpop.f32.mrb[11].mxu1 }
0x11aa   :  { %2429 = vtanh.f32 %v1269_v63 }
0x11ab   :  { %v1367_v7 = vpop.f32.mrb[12].mxu0 }
0x11ac   :  { %v1368_v3 = vadd.f32 %v2674_v16, %v1367_v7  ;;  %v2123_v4 = vpop.f32.mrb[13].mxu0 }
0x11ae   :  { %2431 = vtanh.f32 %v1368_v3 }
0x11b4   :  { %v2430_v6 = vpop.eup %2429 }
0x11b5   :  { %1277 = vrot.lane.b32.xlu0 %v2430_v6, %s2551_s30  ;;  %v1273_v8 = vmul.f32 0.5, %v2430_v6 }
0x11b7   :  { %v1274_v9 = vadd.f32 0.5, %v1273_v8 }
0x11b8   :  { %v2432_v10 = vpop.eup %2431 }
0x11b9   :  { %1376 = vrot.lane.b32.xlu1 %v2432_v10, %s2551_s30  ;;  %v1372_v11 = vmul.f32 0.5, %v2432_v10  ;;  %v1275_v18 = vmul.f32 %v1274_v9, %v2908_v46 }
0x11bb   :  { %v1373_v14 = vadd.f32 0.5, %v1372_v11 }
0x11bd   :  { %v1374_v21 = vmul.f32 %v1373_v14, %v2912_v50 }
0x1227   :  { %v1278_v13 = vpop.permute.xlu0 %1277 }
0x1228   :  { %v1280_v12 = vmul.f32 %v1278_v13, %v1274_v9 }
0x122a   :  { %1282 = vrot.lane.b32.xlu0 %v1280_v12, %s2551_s30 }
0x122b   :  { %v1377_v15 = vpop.permute.xlu1 %1376 }
0x122c   :  { %v1379_v17 = vmul.f32 %v1377_v15, %v1373_v14 }
0x122e   :  { %1381 = vrot.lane.b32.xlu1 %v1379_v17, %s2551_s30 }
0x129c   :  { %v1283_v19 = vpop.permute.xlu0 %1282 }
0x129d   :  { %v1285_v20 = vadd.f32 %v1283_v19, %v1275_v18 }
0x129f   :  { %2433 = vtanh.f32 %v1285_v20 }
0x12a0   :  { %v1382_v22 = vpop.permute.xlu1 %1381 }
0x12a1   :  { %v1384_v23 = vadd.f32 %v1382_v22, %v1374_v21 }
0x12a3   :  { %2435 = vtanh.f32 %v1384_v23 }
0x12a9   :  { %v2434_v24 = vpop.eup %2433 }
0x12aa   :  { %1288 = vrot.lane.b32.xlu0 %v2434_v24, %s2551_s30 }
0x12ad   :  { %v2436_v25 = vpop.eup %2435 }
0x12ae   :  { %1387 = vrot.lane.b32.xlu1 %v2436_v25, %s2551_s30 }
0x131c   :  { %v1289_v26 = vpop.permute.xlu0 %1288 }
0x131d   :  { %v1291_v27 = vmul.f32 %v1289_v26, %v1274_v9 }
0x131f   :  { %1396 = vrot.lane.b32.xlu1 %v1291_v27, %s2552_s2 }
0x1320   :  { %v1388_v28 = vpop.permute.xlu1 %1387 }
0x1321   :  { %v1390_v29 = vmul.f32 %v1388_v28, %v1373_v14 }
0x1323   :  { %1392 = vrot.lane.b32.xlu0 %v1390_v29, %s2553_s6 }
0x1327   :  { %1495 = vrot.lane.b32.xlu0 %v1390_v29, %s2552_s2 }
0x1391   :  { %v1397_v30 = vpop.permute.xlu1 %1396 }
0x1395   :  { %v1393_v32 = vpop.permute.xlu0 %1392 }
0x1396   :  { %v1399_v34 = vsel %vm93_vm1, %v1393_v32, %v1397_v30 }
0x1397   :  { %2141 = vmatmul.mubr.msk.f32.vlgmr.msra.gmra.mrb[12].mxu1 %vm95_vm2, %v1399_v34 }
0x1398   :  { %2363 = vmatpush3.bf16.msra.mxu1 %v2682_v31  ;;  %2178 = vmatprep.mubr.msk.f32.mxu1 %vm2549_vm0, %v2550_v1 }
0x1399   :  { %v1496_v37 = vpop.permute.xlu0 %1495  ;;  %2364 = vmatprep.subr.bf16.mxu1 %v2548_v0 }
0x139a   :  { %v1498_v38 = vsel %vm93_vm1, %v1494_v35, %v1496_v37 }
0x139b   :  { %2160 = vmatmul.mubr.msk.f32.vlgmr.msra.gmra.mrb[14].mxu0 %vm95_vm2, %v1498_v38 }
0x139c   :  { %2366 = vmatpush3.bf16.msra.mxu1 %v2685_v33 }
0x139d   :  { %2367 = vmatprep.subr.bf16.mxu1 %v2548_v0 }
0x13a0   :  { %2369 = vmatpush3.bf16.msra.mxu1 %v2689_v36 }
0x13a1   :  { %2370 = vmatprep.subr.bf16.mxu1 %v2548_v0 }
0x13a4   :  { %2372 = vmatpush3.bf16.msra.mxu1 %v2694_v40 }
0x146a   :  { %v1469_v31 = vpop.f32.mrb[12].mxu1 }
0x146b   :  { %v1470_v1 = vadd.f32 %v2728_v48, %v1469_v31  ;;  %v2142_v39 = vpop.f32.mrb[13].mxu1 }
0x146d   :  { %2437 = vtanh.f32 %v1470_v1 }
0x146e   :  { %v1568_v41 = vpop.f32.mrb[14].mxu0 }
0x146f   :  { %v1569_v42 = vadd.f32 %v2674_v16, %v1568_v41  ;;  %v2161_v43 = vpop.f32.mrb[15].mxu0 }
0x1471   :  { %2439 = vtanh.f32 %v1569_v42 }
0x1477   :  { %v2438_v44 = vpop.eup %2437 }
0x1478   :  { %1478 = vrot.lane.b32.xlu1 %v2438_v44, %s2551_s30  ;;  %v1474_v36 = vmul.f32 0.5, %v2438_v44 }
0x147a   :  { %v1475_v0 = vadd.f32 0.5, %v1474_v36 }
0x147b   :  { %v2440_v33 = vpop.eup %2439 }
0x147c   :  { %1577 = vrot.lane.b32.xlu0 %v2440_v33, %s2551_s30  ;;  %v1573_v45 = vmul.f32 0.5, %v2440_v33  ;;  %v1476_v16 = vmul.f32 %v1475_v0, %v1285_v20 }
0x147e   :  { %v1574_v47 = vadd.f32 0.5, %v1573_v45 }
0x1480   :  { %v1575_v53 = vmul.f32 %v1574_v47, %v1384_v23 }
0x14ea   :  { %v1479_v40 = vpop.permute.xlu1 %1478 }
0x14eb   :  { %v1481_v46 = vmul.f32 %v1479_v40, %v1475_v0 }
0x14ed   :  { %1483 = vrot.lane.b32.xlu1 %v1481_v46, %s2551_s30 }
0x14ee   :  { %v1578_v49 = vpop.permute.xlu0 %1577 }
0x14ef   :  { %v1580_v50 = vmul.f32 %v1578_v49, %v1574_v47 }
0x14f1   :  { %1582 = vrot.lane.b32.xlu0 %v1580_v50, %s2551_s30 }
0x155f   :  { %v1484_v51 = vpop.permute.xlu1 %1483 }
0x1560   :  { %v1486_v52 = vadd.f32 %v1484_v51, %v1476_v16 }
0x1562   :  { %2441 = vtanh.f32 %v1486_v52 }
0x1563   :  { %v1583_v54 = vpop.permute.xlu0 %1582 }
0x1564   :  { %v1585_v55 = vadd.f32 %v1583_v54, %v1575_v53 }
0x1566   :  { %2443 = vtanh.f32 %v1585_v55 }
0x156c   :  { %v2442_v56 = vpop.eup %2441 }
0x156d   :  { %1489 = vrot.lane.b32.xlu1 %v2442_v56, %s2551_s30 }
0x1570   :  { %v2444_v57 = vpop.eup %2443 }
0x1571   :  { %1588 = vrot.lane.b32.xlu0 %v2444_v57, %s2551_s30 }
0x15df   :  { %v1490_v58 = vpop.permute.xlu1 %1489 }
0x15e0   :  { %v1492_v59 = vmul.f32 %v1490_v58, %v1475_v0 }
0x15e2   :  { %1597 = vrot.lane.b32.xlu0 %v1492_v59, %s2552_s2 }
0x15e3   :  { %v1589_v60 = vpop.permute.xlu0 %1588 }
0x15e4   :  { %v1591_v61 = vmul.f32 %v1589_v60, %v1574_v47 }
0x15e6   :  { %1593 = vrot.lane.b32.xlu1 %v1591_v61, %s2553_s6 }
0x1654   :  { %v1598_v62 = vpop.permute.xlu0 %1597 }
0x1658   :  { %v1594_v5 = vpop.permute.xlu1 %1593 }
0x1659   :  { %v1600_v63 = vsel %vm93_vm1, %v1594_v5, %v1598_v62 }
0x165a   :  { %2179 = vmatmul.mubr.msk.f32.vlgmr.msra.gmra.mrb[14].mxu1 %vm95_vm2, %v1600_v63 }
0x172d   :  { %v1670_v2 = vpop.f32.mrb[14].mxu1 }
0x172e   :  { %v1671_v7 = vadd.f32 %v2728_v48, %v1670_v2  ;;  %v2180_v3 = vpop.f32.mrb[15].mxu1 }
0x1730   :  { %2445 = vtanh.f32 %v1671_v7 }
0x173a   :  { %v2446_v4 = vpop.eup %2445 }
0x173b   :  { %1679 = vrot.lane.b32.xlu1 %v2446_v4, %s2551_s30  ;;  %v1675_v6 = vmul.f32 0.5, %v2446_v4 }
0x173d   :  { %v1676_v10 = vadd.f32 0.5, %v1675_v6 }
0x173f   :  { %v1677_v11 = vmul.f32 %v1676_v10, %v1486_v52 }
0x17ad   :  { %v1680_v8 = vpop.permute.xlu1 %1679 }
0x17ae   :  { %v1682_v9 = vmul.f32 %v1680_v8, %v1676_v10 }
0x17b0   :  { %1684 = vrot.lane.b32.xlu0 %v1682_v9, %s2551_s30 }
0x1822   :  { %v1685_v13 = vpop.permute.xlu0 %1684 }
0x1823   :  { %v1687_v12 = vadd.f32 %v1685_v13, %v1677_v11 }
0x1825   :  { %2447 = vtanh.f32 %v1687_v12 }
0x182f   :  { %v2448_v14 = vpop.eup %2447 }
0x1830   :  { %1690 = vrot.lane.b32.xlu1 %v2448_v14, %s2551_s30 }
0x18a2   :  { %v1691_v15 = vpop.permute.xlu1 %1690 }
0x18a3   :  { %v1693_v48 = vmul.f32 %v1691_v15, %v1676_v10 }
0x18a5   :  { %1695 = vrot.lane.b32.xlu0 %v1693_v48, %s2553_s6 }
0x1917   :  { %v1696_v17 = vpop.permute.xlu0 %1695 }
0x1918   :  { %1698 = vst.msk [vmem:[#allocation8] sm:$0xff] %vm93_vm1, %v1696_v17 }
0x1919   :  { %2526 = shalt.err (!%p2523_p0)
}
0x191a   :  { %s2527_s13 = scalar_lea.hbm %s3004_s5, 128 }
0x191b   :  { %p2528_p1 = scmp.ne.s32.totalorder %s3004_s5, %s2527_s13  ;;  %p2531_p2 = scmp.lt.u32.totalorder %s2527_s13, %s3004_s5 }
0x191d   :  { %p2533_p3 = pnand %p2531_p2, %p2528_p1 }
0x191f   :  { %2536 = shalt.err (!%p2533_p3)
}
0x1920   :  { %1708 = dma.vmem_to_hbm [thread:$0]  %s1706_s9, 128, %s3004_s5, [#allocation4]  }
0x1921   :  { %2541 = dma.done.wait [#allocation4], 128  }
0x1922   :  { %2542 = vsyncadd [#allocation4], 4294967168 }
0x1923   :  { %1712 = vsyncpa [#allocation3], 1 }
0x1924   :  { %1713 = vsyncpa [#allocation6], 1 }
0x1925   :  { %1714 = vsyncpa [#allocation4], 1 }

</bundles_post_ra>
